<compile_context>
chip_gen: v7x
topology: tpu7x:2x2x1
jax: 0.10.0
libtpu: 0.0.40
codegen_flags: <defaults>
</compile_context>

<pallas_src>
import jax
import jax.numpy as jnp
from jax.experimental import pallas as pl
from jax.experimental.pallas import tpu as pltpu


# ---------------------------------------------------------------------------
# Pallas kernels
# ---------------------------------------------------------------------------
def conv1_pool_kernel(p_ref, w_ref, b_ref, o_ref):
    """conv1 as one stacked im2col matmul + bias + ReLU + 2x2 max-pool.

    p_ref holds the im2col patches of the four 2x2-pool branches stacked on the
    row axis: [p00; p01; p10; p11], each (B*12*12, 25).  max(relu(.)) ==
    relu(max(.)), so taking the max over the four row blocks after the fused
    bias+ReLU reproduces PyTorch's relu -> F.max_pool2d(x, 2) exactly.
    """
    y = jnp.dot(p_ref[...], w_ref[...], preferred_element_type=jnp.float32)
    y = jnp.maximum(y + b_ref[...], 0.0)
    r = y.shape[0] // 4
    o_ref[...] = jnp.maximum(jnp.maximum(y[0:r], y[r:2 * r]),
                             jnp.maximum(y[2 * r:3 * r], y[3 * r:4 * r]))


def tail_kernel(p2_ref, w2_ref, b2_ref, w1_ref, b1_ref, wf2_ref, bf2_ref,
                o_ref, y2_ref):
    """conv2 (stacked im2col matmul) + bias + ReLU + 2x2 max-pool
    + fc1 + ReLU + fc2 — all intermediates stay in VMEM."""
    # conv2 over the 4 stacked pool branches, rows ordered (branch, spatial, batch)
    y = jnp.dot(p2_ref[...], w2_ref[...], preferred_element_type=jnp.float32)
    y = jnp.maximum(y + b2_ref[...], 0.0)
    r = y.shape[0] // 4                                   # pooled rows = spatial*batch
    y2_ref[...] = jnp.maximum(jnp.maximum(y[0:r], y[r:2 * r]),
                              jnp.maximum(y[2 * r:3 * r], y[3 * r:4 * r]))

    nb = o_ref.shape[0]                                   # batch
    ns = r // nb                                          # spatial positions (4*4)
    # (spatial, batch, cout) -> lane-dense (batch, spatial*cout) feature matrix,
    # built from sublane slices of the VMEM scratch (no HBM round trip).
    feat = jnp.concatenate(
        [y2_ref[s * nb:(s + 1) * nb, :] for s in range(ns)], axis=1)

    h = jnp.dot(feat.astype(w1_ref.dtype), w1_ref[...],
                preferred_element_type=jnp.float32)
    h = jnp.maximum(h + b1_ref[...], 0.0)
    o_ref[...] = jnp.dot(h.astype(wf2_ref.dtype), wf2_ref[...],
                         preferred_element_type=jnp.float32) + bf2_ref[...]


# ---------------------------------------------------------------------------
# pallas_call wrappers (tiny shapes -> one full-array block, grid=(1,))
# ---------------------------------------------------------------------------
def _spec(shape):
    return pl.BlockSpec(shape, lambda i, n=len(shape): (0,) * n)


def conv1_stage(p1, wm, bm):
    rows, cout = p1.shape[0] // 4, wm.shape[1]
    return pl.pallas_call(
        conv1_pool_kernel,
        out_shape=jax.ShapeDtypeStruct((rows, cout), jnp.float32),
        grid=(1,),
        in_specs=[_spec(p1.shape), _spec(wm.shape), _spec(bm.shape)],
        out_specs=_spec((rows, cout)),
        compiler_params=pltpu.CompilerParams(dimension_semantics=("arbitrary",)),
    )(p1, wm, bm)


def tail_stage(p2, w2m, b2m, w1m, b1m, wf2m, bf2m, batch):
    rp, cout2, ncls = p2.shape[0] // 4, w2m.shape[1], wf2m.shape[1]
    return pl.pallas_call(
        tail_kernel,
        out_shape=jax.ShapeDtypeStruct((batch, ncls), jnp.float32),
        grid=(1,),
        in_specs=[_spec(p2.shape), _spec(w2m.shape), _spec(b2m.shape),
                  _spec(w1m.shape), _spec(b1m.shape),
                  _spec(wf2m.shape), _spec(bf2m.shape)],
        out_specs=_spec((batch, ncls)),
        scratch_shapes=[pltpu.VMEM((rp, cout2), jnp.float32)],
        compiler_params=pltpu.CompilerParams(dimension_semantics=("arbitrary",)),
    )(p2, w2m, b2m, w1m, b1m, wf2m, bf2m)


# ---------------------------------------------------------------------------
# Host glue: channels-last im2col (pure gather) + QNN classical simulation
# ---------------------------------------------------------------------------
def extract_patches_nhwc(x, k):
    """x: (B, H, W, C) -> (B, Ho, Wo, k*k*C), feature order (kh, kw, c)."""
    b, h, w, c = x.shape
    ho, wo = h - k + 1, w - k + 1
    i = jnp.arange(ho)[:, None] + jnp.arange(k)[None, :]   # (Ho, k)
    j = jnp.arange(wo)[:, None] + jnp.arange(k)[None, :]   # (Wo, k)
    p = x[:, i, :, :]            # (B, Ho, k, W, C)
    p = p[:, :, :, j, :]         # (B, Ho, k, Wo, k, C)
    p = jnp.transpose(p, (0, 1, 3, 2, 4, 5))               # (B, Ho, Wo, kh, kw, C)
    return p.reshape(b, ho, wo, k * k * c)


def qnn_forward(x, theta):
    """Exact classical statevector sim of the EstimatorQNN circuit.

    Circuit: ZZFeatureMap(2) [reps=2] o RealAmplitudes(2, reps=1), observable Z@Z.
    x: (B, 2) circuit inputs, theta: (4,) ansatz weights -> (B, 1) expectation.
    Qiskit little-endian convention: state index = 2*q1 + q0.
    """
    bsz = x.shape[0]
    psi = jnp.zeros((bsz, 4), jnp.complex64).at[:, 0].set(1.0)
    x0, x1 = x[:, 0], x[:, 1]
    inv_sqrt2 = 1.0 / jnp.sqrt(2.0)

    def cols(p):
        return p[:, 0], p[:, 1], p[:, 2], p[:, 3]

    def h_q0(p):
        a0, a1, a2, a3 = cols(p)
        return jnp.stack([inv_sqrt2 * (a0 + a1), inv_sqrt2 * (a0 - a1),
                          inv_sqrt2 * (a2 + a3), inv_sqrt2 * (a2 - a3)], axis=1)

    def h_q1(p):
        a0, a1, a2, a3 = cols(p)
        return jnp.stack([inv_sqrt2 * (a0 + a2), inv_sqrt2 * (a1 + a3),
                          inv_sqrt2 * (a0 - a2), inv_sqrt2 * (a1 - a3)], axis=1)

    def p_q0(p, lam):
        ph = jnp.exp(1j * lam)
        one = jnp.ones_like(ph)
        return p * jnp.stack([one, ph, one, ph], axis=1)

    def p_q1(p, lam):
        ph = jnp.exp(1j * lam)
        one = jnp.ones_like(ph)
        return p * jnp.stack([one, one, ph, ph], axis=1)

    def cx_01(p):  # control q0, target q1: swap |01> and |11>
        return p[:, jnp.array([0, 3, 2, 1])]

    def ry_q0(p, th):
        c, s = jnp.cos(th / 2), jnp.sin(th / 2)
        a0, a1, a2, a3 = cols(p)
        return jnp.stack([c * a0 - s * a1, s * a0 + c * a1,
                          c * a2 - s * a3, s * a2 + c * a3], axis=1)

    def ry_q1(p, th):
        c, s = jnp.cos(th / 2), jnp.sin(th / 2)
        a0, a1, a2, a3 = cols(p)
        return jnp.stack([c * a0 - s * a2, c * a1 - s * a3,
                          s * a0 + c * a2, s * a1 + c * a3], axis=1)

    for _ in range(2):  # ZZFeatureMap default reps=2
        psi = h_q1(h_q0(psi))
        psi = p_q0(psi, 2.0 * x0)
        psi = p_q1(psi, 2.0 * x1)
        psi = cx_01(psi)
        psi = p_q1(psi, 2.0 * (jnp.pi - x0) * (jnp.pi - x1))
        psi = cx_01(psi)
    # RealAmplitudes(2, reps=1): RY layer, CX, RY layer
    psi = ry_q1(ry_q0(psi, theta[0]), theta[1])
    psi = cx_01(psi)
    psi = ry_q1(ry_q0(psi, theta[2]), theta[3])

    prob = jnp.abs(psi) ** 2
    z = prob[:, 0] - prob[:, 1] - prob[:, 2] + prob[:, 3]   # <Z@Z>
    return z[:, None].astype(jnp.float32)                    # (B, 1)


# ---------------------------------------------------------------------------
# Full forward pass (matches Net.forward)
# ---------------------------------------------------------------------------
def net_forward(x, params):
    bsz, k = x.shape[0], 5

    # conv1 + ReLU + max_pool2d(2)  (Pallas kernel A), channels-last throughout.
    xn = jnp.transpose(x, (0, 2, 3, 1))                       # (B, 28, 28, 1)
    pat1 = extract_patches_nhwc(xn, k)                        # (B, 24, 24, 25)
    hp = pat1.shape[1] // 2                                   # 12
    p1 = jnp.concatenate(
        [pat1[:, py::2, px::2, :].reshape(bsz * hp * hp, pat1.shape[-1])
         for py in (0, 1) for px in (0, 1)], axis=0).astype(jnp.bfloat16)
    y1 = conv1_stage(p1, params["conv1_wm"], params["conv1_bm"])   # (B*144, 2)
    y1 = y1.reshape(bsz, hp, hp, -1)                          # NHWC, no NCHW round trip

    # conv2 + ReLU + max_pool2d(2) + fc1 + ReLU + fc2  (fused Pallas kernel B).
    pat2 = extract_patches_nhwc(y1, k)                        # (B, 8, 8, 50)
    hq = pat2.shape[1] // 2                                   # 4
    p2 = jnp.concatenate(
        [pat2[:, py::2, px::2, :].transpose(1, 2, 0, 3).reshape(hq * hq * bsz,
                                                                pat2.shape[-1])
         for py in (0, 1) for px in (0, 1)], axis=0).astype(jnp.bfloat16)
    # TODO(synk): Dropout2d is the identity here (deterministic eval-mode inference).
    z = tail_stage(p2, params["conv2_wm"], params["conv2_bm"],
                   params["fc1_wm"], params["fc1_bm"],
                   params["fc2_wm"], params["fc2_bm"], bsz)   # (B, 2) = fc2 output

    # TODO(synk): TorchConnector/EstimatorQNN (complex statevector + trig of
    # data-dependent angles) has no Pallas equivalent; simulated exactly in
    # plain JAX. The (B,2)-sized fc3 + log-softmax tail fuses into the same
    # XLA elementwise cluster instead of paying a dedicated kernel launch.
    e = qnn_forward(z, params["qnn_theta"])                   # (B, 1)
    y = e * params["fc3_wm"] + params["fc3_bm"]               # (B,1)*(1,2)+(1,2) -> (B,2)
    m = jnp.max(y, axis=-1, keepdims=True)
    lse = jnp.log(jnp.sum(jnp.exp(y - m), axis=-1, keepdims=True)) + m
    return y - lse


# ---------------------------------------------------------------------------
# Deterministic parameter init (PyTorch layout) + one-time kernel repack
# ---------------------------------------------------------------------------
def init_params(key):
    ks = jax.random.split(key, 11)

    def nrm(k_, shape, scale=0.1):
        return scale * jax.random.normal(k_, shape, dtype=jnp.float32)

    return {
        "conv1_w": nrm(ks[0], (2, 1, 5, 5)),
        "conv1_b": nrm(ks[1], (2,)),
        "conv2_w": nrm(ks[2], (16, 2, 5, 5)),
        "conv2_b": nrm(ks[3], (16,)),
        "fc1_w": nrm(ks[4], (64, 256)),
        "fc1_b": nrm(ks[5], (64,)),
        "fc2_w": nrm(ks[6], (2, 64)),
        "fc2_b": nrm(ks[7], (2,)),
        "qnn_theta": nrm(ks[8], (4,), scale=1.0),   # RealAmplitudes(2, reps=1) weights
        "fc3_w": nrm(ks[9], (2, 1)),
        "fc3_b": nrm(ks[10], (2,)),
    }


def prepare_params(p):
    """One-time repack of PyTorch-layout weights into the layouts the kernels
    consume: channels-last feature order, bf16 MXU operands, f32 biases."""
    def conv_w(w):  # (Cout, Cin, KH, KW) -> (KH*KW*Cin, Cout), order (kh, kw, cin)
        co = w.shape[0]
        return jnp.transpose(w, (0, 2, 3, 1)).reshape(co, -1).T.astype(jnp.bfloat16)

    # fc1 expects flatten order (c, h, w); our feature matrix is (h, w, c).
    fc1 = p["fc1_w"].reshape(64, 16, 4, 4)                    # (out, c, ph, pw)
    fc1 = jnp.transpose(fc1, (0, 2, 3, 1)).reshape(64, 256)   # (out, (ph, pw, c))
    return {
        "conv1_wm": conv_w(p["conv1_w"]),
        "conv1_bm": p["conv1_b"].reshape(1, -1),
        "conv2_wm": conv_w(p["conv2_w"]),
        "conv2_bm": p["conv2_b"].reshape(1, -1),
        "fc1_wm": fc1.T.astype(jnp.bfloat16),                 # (256, 64)
        "fc1_bm": p["fc1_b"].reshape(1, -1),
        "fc2_wm": p["fc2_w"].T.astype(jnp.bfloat16),          # (64, 2)
        "fc2_bm": p["fc2_b"].reshape(1, -1),
        "fc3_wm": p["fc3_w"].T,                               # (1, 2), f32
        "fc3_bm": p["fc3_b"].reshape(1, -1),
        "qnn_theta": p["qnn_theta"],
    }


if __name__ == "__main__":
    key = jax.random.PRNGKey(0)
    pkey, xkey = jax.random.split(key)
    params = prepare_params(init_params(pkey))

    # fc1 in_features=256 = 16*4*4 after two 5x5 convs + 2x2 pools => 28x28 input.
    x = jax.random.normal(xkey, (2, 1, 28, 28), dtype=jnp.float32)

    out = jax.block_until_ready(jax.jit(net_forward)(x, params))

    assert out.shape == (2, 2)
    assert bool(jnp.all(jnp.isfinite(out)))
    # log-softmax rows must exp-sum to 1
    assert bool(jnp.allclose(jnp.sum(jnp.exp(out), axis=-1), 1.0, atol=1e-4))
    print("KERNEL_OK")
</pallas_src>

<mosaic_0001>
module attributes {stable_mosaic.version = 11 : i64} {
  func.func @conv1_pool_kernel(%arg0: i32, %arg1: memref<1152x25xbf16, #tpu.memory_space<vmem>>, %arg2: memref<25x2xbf16, #tpu.memory_space<vmem>>, %arg3: memref<1x2xf32, #tpu.memory_space<vmem>>, %arg4: memref<288x2xf32, #tpu.memory_space<vmem>>) attributes {dimension_semantics = [#tpu.dimension_semantics<arbitrary>], iteration_bounds = array<i64: 1>, scalar_prefetch = 0 : i64, scratch_operands = 0 : i64, tpu.core_type = #tpu.core_type<tc>, window_params = [{pipeline_mode = #tpu.pipeline_mode<synchronous>, transform_indices = @transform_0, window_bounds = array<i64: 1152, 25>}, {pipeline_mode = #tpu.pipeline_mode<synchronous>, transform_indices = @transform_1, window_bounds = array<i64: 25, 2>}, {pipeline_mode = #tpu.pipeline_mode<synchronous>, transform_indices = @transform_2, window_bounds = array<i64: 1, 2>}, {pipeline_mode = #tpu.pipeline_mode<synchronous>, transform_indices = @transform_3, window_bounds = array<i64: 288, 2>}]} {
    %c0 = arith.constant 0 : index
    %c0_0 = arith.constant 0 : index
    %0 = vector.load %arg1[%c0, %c0_0] : memref<1152x25xbf16, #tpu.memory_space<vmem>>, vector<1152x25xbf16>
    %c0_1 = arith.constant 0 : index
    %c0_2 = arith.constant 0 : index
    %1 = vector.load %arg2[%c0_1, %c0_2] : memref<25x2xbf16, #tpu.memory_space<vmem>>, vector<25x2xbf16>
    %cst = arith.constant dense<0.000000e+00> : vector<1152x2xf32>
    %2 = tpu.matmul %0, %1, %cst {dimension_numbers = #tpu.dot_dimension_numbers<[1], [0], [0], [1], [0, 0, 1, 1], [], []>} : vector<1152x25xbf16>, vector<25x2xbf16>, vector<1152x2xf32> -> vector<1152x2xf32>
    %c0_3 = arith.constant 0 : index
    %c0_4 = arith.constant 0 : index
    %3 = vector.load %arg3[%c0_3, %c0_4] : memref<1x2xf32, #tpu.memory_space<vmem>>, vector<1x2xf32>
    %4 = vector.broadcast %3 : vector<1x2xf32> to vector<1152x2xf32>
    %5 = arith.addf %2, %4 : vector<1152x2xf32>
    %cst_5 = arith.constant 0.000000e+00 : f32
    %6 = vector.broadcast %cst_5 : f32 to vector<1152x2xf32>
    %7 = arith.maximumf %5, %6 : vector<1152x2xf32>
    %8 = vector.extract_strided_slice %7 {offsets = [0, 0], sizes = [288, 2], strides = [1, 1]} : vector<1152x2xf32> to vector<288x2xf32>
    %9 = vector.extract_strided_slice %7 {offsets = [288, 0], sizes = [288, 2], strides = [1, 1]} : vector<1152x2xf32> to vector<288x2xf32>
    %10 = arith.maximumf %8, %9 : vector<288x2xf32>
    %11 = vector.extract_strided_slice %7 {offsets = [576, 0], sizes = [288, 2], strides = [1, 1]} : vector<1152x2xf32> to vector<288x2xf32>
    %12 = vector.extract_strided_slice %7 {offsets = [864, 0], sizes = [288, 2], strides = [1, 1]} : vector<1152x2xf32> to vector<288x2xf32>
    %13 = arith.maximumf %11, %12 : vector<288x2xf32>
    %14 = arith.maximumf %10, %13 : vector<288x2xf32>
    %c0_6 = arith.constant 0 : index
    %c0_7 = arith.constant 0 : index
    %15 = vector.load %arg4[%c0_6, %c0_7] : memref<288x2xf32, #tpu.memory_space<vmem>>, vector<288x2xf32>
    tpu.vector_store %arg4[%c0_6, %c0_7], %14 {strides = array<i32>} : memref<288x2xf32, #tpu.memory_space<vmem>>, vector<288x2xf32>,
    return
  }
  func.func @transform_0(%arg0: i32) -> (i32, i32) {
    %c0_i32 = arith.constant 0 : i32
    %c0_i32_0 = arith.constant 0 : i32
    %c0_i32_1 = arith.constant 0 : i32
    return %c0_i32, %c0_i32_0 : i32, i32
  }
  func.func @transform_1(%arg0: i32) -> (i32, i32) {
    %c0_i32 = arith.constant 0 : i32
    %c0_i32_0 = arith.constant 0 : i32
    %c0_i32_1 = arith.constant 0 : i32
    return %c0_i32, %c0_i32_0 : i32, i32
  }
  func.func @transform_2(%arg0: i32) -> (i32, i32) {
    %c0_i32 = arith.constant 0 : i32
    %c0_i32_0 = arith.constant 0 : i32
    %c0_i32_1 = arith.constant 0 : i32
    return %c0_i32, %c0_i32_0 : i32, i32
  }
  func.func @transform_3(%arg0: i32) -> (i32, i32) {
    %c0_i32 = arith.constant 0 : i32
    %c0_i32_0 = arith.constant 0 : i32
    %c0_i32_1 = arith.constant 0 : i32
    return %c0_i32, %c0_i32_0 : i32, i32
  }
}

module attributes {stable_mosaic.version = 11 : i64} {
  func.func @tail_kernel(%arg0: i32, %arg1: memref<128x50xbf16, #tpu.memory_space<vmem>>, %arg2: memref<50x16xbf16, #tpu.memory_space<vmem>>, %arg3: memref<1x16xf32, #tpu.memory_space<vmem>>, %arg4: memref<256x64xbf16, #tpu.memory_space<vmem>>, %arg5: memref<1x64xf32, #tpu.memory_space<vmem>>, %arg6: memref<64x2xbf16, #tpu.memory_space<vmem>>, %arg7: memref<1x2xf32, #tpu.memory_space<vmem>>, %arg8: memref<2x2xf32, #tpu.memory_space<vmem>>, %arg9: memref<32x16xf32, #tpu.memory_space<vmem>>) attributes {dimension_semantics = [#tpu.dimension_semantics<arbitrary>], iteration_bounds = array<i64: 1>, scalar_prefetch = 0 : i64, scratch_operands = 1 : i64, tpu.core_type = #tpu.core_type<tc>, window_params = [{pipeline_mode = #tpu.pipeline_mode<synchronous>, transform_indices = @transform_0, window_bounds = array<i64: 128, 50>}, {pipeline_mode = #tpu.pipeline_mode<synchronous>, transform_indices = @transform_1, window_bounds = array<i64: 50, 16>}, {pipeline_mode = #tpu.pipeline_mode<synchronous>, transform_indices = @transform_2, window_bounds = array<i64: 1, 16>}, {pipeline_mode = #tpu.pipeline_mode<synchronous>, transform_indices = @transform_3, window_bounds = array<i64: 256, 64>}, {pipeline_mode = #tpu.pipeline_mode<synchronous>, transform_indices = @transform_4, window_bounds = array<i64: 1, 64>}, {pipeline_mode = #tpu.pipeline_mode<synchronous>, transform_indices = @transform_5, window_bounds = array<i64: 64, 2>}, {pipeline_mode = #tpu.pipeline_mode<synchronous>, transform_indices = @transform_6, window_bounds = array<i64: 1, 2>}, {pipeline_mode = #tpu.pipeline_mode<synchronous>, transform_indices = @transform_7, window_bounds = array<i64: 2, 2>}]} {
    %c0 = arith.constant 0 : index
    %c0_0 = arith.constant 0 : index
    %0 = vector.load %arg1[%c0, %c0_0] : memref<128x50xbf16, #tpu.memory_space<vmem>>, vector<128x50xbf16>
    %c0_1 = arith.constant 0 : index
    %c0_2 = arith.constant 0 : index
    %1 = vector.load %arg2[%c0_1, %c0_2] : memref<50x16xbf16, #tpu.memory_space<vmem>>, vector<50x16xbf16>
    %cst = arith.constant dense<0.000000e+00> : vector<128x16xf32>
    %2 = tpu.matmul %0, %1, %cst {dimension_numbers = #tpu.dot_dimension_numbers<[1], [0], [0], [1], [0, 0, 1, 1], [], []>} : vector<128x50xbf16>, vector<50x16xbf16>, vector<128x16xf32> -> vector<128x16xf32>
    %c0_3 = arith.constant 0 : index
    %c0_4 = arith.constant 0 : index
    %3 = vector.load %arg3[%c0_3, %c0_4] : memref<1x16xf32, #tpu.memory_space<vmem>>, vector<1x16xf32>
    %4 = vector.broadcast %3 : vector<1x16xf32> to vector<128x16xf32>
    %5 = arith.addf %2, %4 : vector<128x16xf32>
    %cst_5 = arith.constant 0.000000e+00 : f32
    %6 = vector.broadcast %cst_5 : f32 to vector<128x16xf32>
    %7 = arith.maximumf %5, %6 : vector<128x16xf32>
    %8 = vector.extract_strided_slice %7 {offsets = [0, 0], sizes = [32, 16], strides = [1, 1]} : vector<128x16xf32> to vector<32x16xf32>
    %9 = vector.extract_strided_slice %7 {offsets = [32, 0], sizes = [32, 16], strides = [1, 1]} : vector<128x16xf32> to vector<32x16xf32>
    %10 = arith.maximumf %8, %9 : vector<32x16xf32>
    %11 = vector.extract_strided_slice %7 {offsets = [64, 0], sizes = [32, 16], strides = [1, 1]} : vector<128x16xf32> to vector<32x16xf32>
    %12 = vector.extract_strided_slice %7 {offsets = [96, 0], sizes = [32, 16], strides = [1, 1]} : vector<128x16xf32> to vector<32x16xf32>
    %13 = arith.maximumf %11, %12 : vector<32x16xf32>
    %14 = arith.maximumf %10, %13 : vector<32x16xf32>
    %c0_6 = arith.constant 0 : index
    %c0_7 = arith.constant 0 : index
    %15 = vector.load %arg9[%c0_6, %c0_7] : memref<32x16xf32, #tpu.memory_space<vmem>>, vector<32x16xf32>
    tpu.vector_store %arg9[%c0_6, %c0_7], %14 {strides = array<i32>} : memref<32x16xf32, #tpu.memory_space<vmem>>, vector<32x16xf32>,
    %c0_8 = arith.constant 0 : index
    %c0_9 = arith.constant 0 : index
    %16 = vector.load %arg9[%c0_8, %c0_9] : memref<32x16xf32, #tpu.memory_space<vmem>>, vector<2x16xf32>
    %c2 = arith.constant 2 : index
    %c0_10 = arith.constant 0 : index
    %17 = vector.load %arg9[%c2, %c0_10] : memref<32x16xf32, #tpu.memory_space<vmem>>, vector<2x16xf32>
    %c4 = arith.constant 4 : index
    %c0_11 = arith.constant 0 : index
    %18 = vector.load %arg9[%c4, %c0_11] : memref<32x16xf32, #tpu.memory_space<vmem>>, vector<2x16xf32>
    %c6 = arith.constant 6 : index
    %c0_12 = arith.constant 0 : index
    %19 = vector.load %arg9[%c6, %c0_12] : memref<32x16xf32, #tpu.memory_space<vmem>>, vector<2x16xf32>
    %c8 = arith.constant 8 : index
    %c0_13 = arith.constant 0 : index
    %20 = vector.load %arg9[%c8, %c0_13] : memref<32x16xf32, #tpu.memory_space<vmem>>, vector<2x16xf32>
    %c10 = arith.constant 10 : index
    %c0_14 = arith.constant 0 : index
    %21 = vector.load %arg9[%c10, %c0_14] : memref<32x16xf32, #tpu.memory_space<vmem>>, vector<2x16xf32>
    %c12 = arith.constant 12 : index
    %c0_15 = arith.constant 0 : index
    %22 = vector.load %arg9[%c12, %c0_15] : memref<32x16xf32, #tpu.memory_space<vmem>>, vector<2x16xf32>
    %c14 = arith.constant 14 : index
    %c0_16 = arith.constant 0 : index
    %23 = vector.load %arg9[%c14, %c0_16] : memref<32x16xf32, #tpu.memory_space<vmem>>, vector<2x16xf32>
    %c16 = arith.constant 16 : index
    %c0_17 = arith.constant 0 : index
    %24 = vector.load %arg9[%c16, %c0_17] : memref<32x16xf32, #tpu.memory_space<vmem>>, vector<2x16xf32>
    %c18 = arith.constant 18 : index
    %c0_18 = arith.constant 0 : index
    %25 = vector.load %arg9[%c18, %c0_18] : memref<32x16xf32, #tpu.memory_space<vmem>>, vector<2x16xf32>
    %c20 = arith.constant 20 : index
    %c0_19 = arith.constant 0 : index
    %26 = vector.load %arg9[%c20, %c0_19] : memref<32x16xf32, #tpu.memory_space<vmem>>, vector<2x16xf32>
    %c22 = arith.constant 22 : index
    %c0_20 = arith.constant 0 : index
    %27 = vector.load %arg9[%c22, %c0_20] : memref<32x16xf32, #tpu.memory_space<vmem>>, vector<2x16xf32>
    %c24 = arith.constant 24 : index
    %c0_21 = arith.constant 0 : index
    %28 = vector.load %arg9[%c24, %c0_21] : memref<32x16xf32, #tpu.memory_space<vmem>>, vector<2x16xf32>
    %c26 = arith.constant 26 : index
    %c0_22 = arith.constant 0 : index
    %29 = vector.load %arg9[%c26, %c0_22] : memref<32x16xf32, #tpu.memory_space<vmem>>, vector<2x16xf32>
    %c28 = arith.constant 28 : index
    %c0_23 = arith.constant 0 : index
    %30 = vector.load %arg9[%c28, %c0_23] : memref<32x16xf32, #tpu.memory_space<vmem>>, vector<2x16xf32>
    %c30 = arith.constant 30 : index
    %c0_24 = arith.constant 0 : index
    %31 = vector.load %arg9[%c30, %c0_24] : memref<32x16xf32, #tpu.memory_space<vmem>>, vector<2x16xf32>
    %32 = tpu.concatenate %16, %17, %18, %19, %20, %21, %22, %23, %24, %25, %26, %27, %28, %29, %30, %31 in 1 : vector<2x16xf32>, vector<2x16xf32>, vector<2x16xf32>, vector<2x16xf32>, vector<2x16xf32>, vector<2x16xf32>, vector<2x16xf32>, vector<2x16xf32>, vector<2x16xf32>, vector<2x16xf32>, vector<2x16xf32>, vector<2x16xf32>, vector<2x16xf32>, vector<2x16xf32>, vector<2x16xf32>, vector<2x16xf32> -> vector<2x256xf32>
    %33 = arith.truncf %32 : vector<2x256xf32> to vector<2x256xbf16>
    %c0_25 = arith.constant 0 : index
    %c0_26 = arith.constant 0 : index
    %34 = vector.load %arg4[%c0_25, %c0_26] : memref<256x64xbf16, #tpu.memory_space<vmem>>, vector<256x64xbf16>
    %cst_27 = arith.constant dense<0.000000e+00> : vector<2x64xf32>
    %35 = tpu.matmul %33, %34, %cst_27 {dimension_numbers = #tpu.dot_dimension_numbers<[1], [0], [0], [1], [0, 0, 1, 1], [], []>} : vector<2x256xbf16>, vector<256x64xbf16>, vector<2x64xf32> -> vector<2x64xf32>
    %c0_28 = arith.constant 0 : index
    %c0_29 = arith.constant 0 : index
    %36 = vector.load %arg5[%c0_28, %c0_29] : memref<1x64xf32, #tpu.memory_space<vmem>>, vector<1x64xf32>
    %37 = vector.broadcast %36 : vector<1x64xf32> to vector<2x64xf32>
    %38 = arith.addf %35, %37 : vector<2x64xf32>
    %cst_30 = arith.constant 0.000000e+00 : f32
    %39 = vector.broadcast %cst_30 : f32 to vector<2x64xf32>
    %40 = arith.maximumf %38, %39 : vector<2x64xf32>
    %41 = arith.truncf %40 : vector<2x64xf32> to vector<2x64xbf16>
    %c0_31 = arith.constant 0 : index
    %c0_32 = arith.constant 0 : index
    %42 = vector.load %arg6[%c0_31, %c0_32] : memref<64x2xbf16, #tpu.memory_space<vmem>>, vector<64x2xbf16>
    %cst_33 = arith.constant dense<0.000000e+00> : vector<2x2xf32>
    %43 = tpu.matmul %41, %42, %cst_33 {dimension_numbers = #tpu.dot_dimension_numbers<[1], [0], [0], [1], [0, 0, 1, 1], [], []>} : vector<2x64xbf16>, vector<64x2xbf16>, vector<2x2xf32> -> vector<2x2xf32>
    %c0_34 = arith.constant 0 : index
    %c0_35 = arith.constant 0 : index
    %44 = vector.load %arg7[%c0_34, %c0_35] : memref<1x2xf32, #tpu.memory_space<vmem>>, vector<1x2xf32>
    %45 = vector.broadcast %44 : vector<1x2xf32> to vector<2x2xf32>
    %46 = arith.addf %43, %45 : vector<2x2xf32>
    %c0_36 = arith.constant 0 : index
    %c0_37 = arith.constant 0 : index
    %47 = vector.load %arg8[%c0_36, %c0_37] : memref<2x2xf32, #tpu.memory_space<vmem>>, vector<2x2xf32>
    tpu.vector_store %arg8[%c0_36, %c0_37], %46 {strides = array<i32>} : memref<2x2xf32, #tpu.memory_space<vmem>>, vector<2x2xf32>,
    return
  }
  func.func @transform_0(%arg0: i32) -> (i32, i32) {
    %c0_i32 = arith.constant 0 : i32
    %c0_i32_0 = arith.constant 0 : i32
    %c0_i32_1 = arith.constant 0 : i32
    return %c0_i32, %c0_i32_0 : i32, i32
  }
  func.func @transform_1(%arg0: i32) -> (i32, i32) {
    %c0_i32 = arith.constant 0 : i32
    %c0_i32_0 = arith.constant 0 : i32
    %c0_i32_1 = arith.constant 0 : i32
    return %c0_i32, %c0_i32_0 : i32, i32
  }
  func.func @transform_2(%arg0: i32) -> (i32, i32) {
    %c0_i32 = arith.constant 0 : i32
    %c0_i32_0 = arith.constant 0 : i32
    %c0_i32_1 = arith.constant 0 : i32
    return %c0_i32, %c0_i32_0 : i32, i32
  }
  func.func @transform_3(%arg0: i32) -> (i32, i32) {
    %c0_i32 = arith.constant 0 : i32
    %c0_i32_0 = arith.constant 0 : i32
    %c0_i32_1 = arith.constant 0 : i32
    return %c0_i32, %c0_i32_0 : i32, i32
  }
  func.func @transform_4(%arg0: i32) -> (i32, i32) {
    %c0_i32 = arith.constant 0 : i32
    %c0_i32_0 = arith.constant 0 : i32
    %c0_i32_1 = arith.constant 0 : i32
    return %c0_i32, %c0_i32_0 : i32, i32
  }
  func.func @transform_5(%arg0: i32) -> (i32, i32) {
    %c0_i32 = arith.constant 0 : i32
    %c0_i32_0 = arith.constant 0 : i32
    %c0_i32_1 = arith.constant 0 : i32
    return %c0_i32, %c0_i32_0 : i32, i32
  }
  func.func @transform_6(%arg0: i32) -> (i32, i32) {
    %c0_i32 = arith.constant 0 : i32
    %c0_i32_0 = arith.constant 0 : i32
    %c0_i32_1 = arith.constant 0 : i32
    return %c0_i32, %c0_i32_0 : i32, i32
  }
  func.func @transform_7(%arg0: i32) -> (i32, i32) {
    %c0_i32 = arith.constant 0 : i32
    %c0_i32_0 = arith.constant 0 : i32
    %c0_i32_1 = arith.constant 0 : i32
    return %c0_i32, %c0_i32_0 : i32, i32
  }
}

</mosaic_0001>

<bundles_post_ra>
// kernel: net_forward.2
= control target key start
LH: loop header
LB: loop body
LE: loop exit
PB: predicated region body
PF: predicated region fallthrough
CT: control target
= control target key end

     0   :  { %vm758_vm0 = vcmask 1043456   ;;  %vm759_vm1 = vcmask 1044480   ;;  %vm541_vm2 = vcmask 203776   ;;  %v2116_v1 = vmov 65535   ;;  %s3257_s1 = inlined_call_operand.vmem [shape: bf16[25,2], index: 1, kind: input, shape index: {}]   ;;  %s3258_s0 = inlined_call_operand.vmem [shape: bf16[1152,25], index: 0, kind: input, shape index: {}]   ;;  %s3259_s2 = inlined_call_operand.vmem [shape: f32[1,2], index: 2, kind: input, shape index: {}]   ;;  %s3260_s3 = inlined_call_operand.vmem [shape: f32[288,2], index: 3, kind: output, shape index: {}]  }
   0x1   :  { %v2041_v0 = vld [vmem:[%s3257_s1] sm:$0xff]   ;;  %v760_v2 = vsel %vm758_vm0, 4294967295, %v2116_v1  ;;  %v2042_v3 = vld [vmem:[%s3257_s1 + $0x8] sm:$0x1f]   ;;  %v2047_v10 = vld [vmem:[%s3258_s0 + $0x10] sm:$0xff]   ;;  %vm1626_vm3 = vcmask 15360  }
   0x2   :  { %1888 = vmatprep.subr.bf16.mxu0 %v2041_v0  ;;  %2036 = vmatprep.subr.bf16.mxu1 %v2041_v0  ;;  %v761_v4 = vsel %vm759_vm1, %v760_v2, 0  ;;  %v2043_v5 = vld [vmem:[%s3258_s0] sm:$0xff]   ;;  %v2045_v8 = vld [vmem:[%s3258_s0 + $0x8] sm:$0xff]   ;;  %v2048_v11 = vld [vmem:[%s3258_s0 + $0x130] sm:$0xff]  }
   0x3   :  { %1889 = vmatpush3.bf16.msra.mxu0 %v2041_v0  ;;  %2038 = vmatpush3.bf16.msra.mxu1 %v2041_v0  ;;  %v763_v6 = vand.u32 %v2042_v3, %v761_v4  ;;  %v2044_v7 = vld [vmem:[%s3258_s0 + $0x120] sm:$0xff]   ;;  %v2046_v9 = vld [vmem:[%s3258_s0 + $0x128] sm:$0xff]   ;;  %v2049_v12 = vld [vmem:[%s3258_s0 + $0x18] sm:$0xff]  }
   0x4   :  { %1892 = vmatprep.mubr.msk.bf16.mxu0 %vm541_vm2, %v2043_v5  ;;  %1964 = vmatprep.mubr.msk.bf16.mxu1 %vm541_vm2, %v2044_v7  ;;  %v2050_v13 = vld [vmem:[%s3258_s0 + $0x138] sm:$0xff]   ;;  %v2051_v14 = vld [vmem:[%s3258_s0 + $0x20] sm:$0xff]   ;;  %v2053_v16 = vld [vmem:[%s3258_s0 + $0x28] sm:$0xff]  }
   0x5   :  { %1890 = vmatprep.subr.bf16.mxu0 %v763_v6  ;;  %2037 = vmatprep.subr.bf16.mxu1 %v763_v6  ;;  %v2052_v15 = vld [vmem:[%s3258_s0 + $0x140] sm:$0xff]   ;;  %v2054_v17 = vld [vmem:[%s3258_s0 + $0x148] sm:$0xff]   ;;  %v2055_v18 = vld [vmem:[%s3258_s0 + $0x30] sm:$0xff]  }
   0x6   :  { %v2056_v19 = vld [vmem:[%s3258_s0 + $0x150] sm:$0xff]   ;;  %v2057_v20 = vld [vmem:[%s3258_s0 + $0x38] sm:$0xff]   ;;  %v2059_v22 = vld [vmem:[%s3258_s0 + $0x40] sm:$0xff]  }
   0x7   :  { %1891 = vmatpush3.bf16.msra.mxu0 %v763_v6  ;;  %2039 = vmatpush3.bf16.msra.mxu1 %v763_v6  ;;  %v2058_v21 = vld [vmem:[%s3258_s0 + $0x158] sm:$0xff]   ;;  %v2060_v23 = vld [vmem:[%s3258_s0 + $0x160] sm:$0xff]   ;;  %v2061_v24 = vld [vmem:[%s3258_s0 + $0x48] sm:$0xff]  }
   0x8   :  { %v2062_v25 = vld [vmem:[%s3258_s0 + $0x168] sm:$0xff]   ;;  %v2063_v26 = vld [vmem:[%s3258_s0 + $0x50] sm:$0xff]   ;;  %v2065_v28 = vld [vmem:[%s3258_s0 + $0x58] sm:$0xff]  }
   0x9   :  { %v2064_v27 = vld [vmem:[%s3258_s0 + $0x170] sm:$0xff]   ;;  %v2066_v29 = vld [vmem:[%s3258_s0 + $0x178] sm:$0xff]   ;;  %v2067_v30 = vld [vmem:[%s3258_s0 + $0x60] sm:$0xff]  }
   0xa   :  { %1893 = vmatmul.mubr.msk.bf16.vlgmr.msra.gmra.mrb[0].mxu0 %vm541_vm2, %v2045_v8  ;;  %1965 = vmatmul.mubr.msk.bf16.vlgmr.msra.gmra.mrb[0].mxu1 %vm541_vm2, %v2046_v9  ;;  %v2068_v31 = vld [vmem:[%s3258_s0 + $0x180] sm:$0xff]   ;;  %v2069_v32 = vld [vmem:[%s3258_s0 + $0x68] sm:$0xff]   ;;  %v2071_v34 = vld [vmem:[%s3258_s0 + $0x70] sm:$0xff]  }
   0xb   :  { %1896 = vmatprep.mubr.msk.bf16.mxu0 %vm541_vm2, %v2047_v10  ;;  %1968 = vmatprep.mubr.msk.bf16.mxu1 %vm541_vm2, %v2048_v11  ;;  %v2070_v33 = vld [vmem:[%s3258_s0 + $0x188] sm:$0xff]   ;;  %v2072_v35 = vld [vmem:[%s3258_s0 + $0x190] sm:$0xff]   ;;  %v2073_v36 = vld [vmem:[%s3258_s0 + $0x78] sm:$0xff]  }
   0xc   :  { %v2074_v37 = vld [vmem:[%s3258_s0 + $0x198] sm:$0xff]   ;;  %v2075_v38 = vld [vmem:[%s3258_s0 + $0x80] sm:$0xff]   ;;  %v2077_v40 = vld [vmem:[%s3258_s0 + $0x88] sm:$0xff]  }
   0xd   :  { %v2076_v39 = vld [vmem:[%s3258_s0 + $0x1a0] sm:$0xff]   ;;  %v2078_v41 = vld [vmem:[%s3258_s0 + $0x1a8] sm:$0xff]   ;;  %v2079_v42 = vld [vmem:[%s3258_s0 + $0x90] sm:$0xff]  }
   0xe   :  { %v2080_v43 = vld [vmem:[%s3258_s0 + $0x1b0] sm:$0xff]   ;;  %v2081_v44 = vld [vmem:[%s3258_s0 + $0x98] sm:$0xff]   ;;  %v2083_v46 = vld [vmem:[%s3258_s0 + $0xa0] sm:$0xff]  }
   0xf   :  { %v2082_v45 = vld [vmem:[%s3258_s0 + $0x1b8] sm:$0xff]   ;;  %v2084_v47 = vld [vmem:[%s3258_s0 + $0x1c0] sm:$0xff]   ;;  %v2085_v48 = vld [vmem:[%s3258_s0 + $0xa8] sm:$0xff]  }
  0x10   :  { %v2086_v49 = vld [vmem:[%s3258_s0 + $0x1c8] sm:$0xff]   ;;  %v2087_v50 = vld [vmem:[%s3258_s0 + $0xb0] sm:$0xff]   ;;  %v2089_v52 = vld [vmem:[%s3258_s0 + $0xb8] sm:$0xff]  }
  0x11   :  { %v2088_v51 = vld [vmem:[%s3258_s0 + $0x1d0] sm:$0xff]   ;;  %v2090_v53 = vld [vmem:[%s3258_s0 + $0x1d8] sm:$0xff]   ;;  %v2091_v54 = vld [vmem:[%s3258_s0 + $0xc0] sm:$0xff]  }
  0x12   :  { %1897 = vmatmul.mubr.msk.bf16.gmra.mrb[4].mxu0 %vm541_vm2, %v2049_v12  ;;  %1969 = vmatmul.mubr.msk.bf16.gmra.mrb[4].mxu1 %vm541_vm2, %v2050_v13  ;;  %v2092_v55 = vld [vmem:[%s3258_s0 + $0x1e0] sm:$0xff]   ;;  %v2093_v56 = vld [vmem:[%s3258_s0 + $0xc8] sm:$0xff]   ;;  %v2095_v58 = vld [vmem:[%s3258_s0 + $0xd0] sm:$0xff]  }
  0x13   :  { %1900 = vmatprep.mubr.msk.bf16.mxu0 %vm541_vm2, %v2051_v14  ;;  %1972 = vmatprep.mubr.msk.bf16.mxu1 %vm541_vm2, %v2052_v15  ;;  %v2094_v57 = vld [vmem:[%s3258_s0 + $0x1e8] sm:$0xff]   ;;  %v2096_v59 = vld [vmem:[%s3258_s0 + $0x1f0] sm:$0xff]   ;;  %v2097_v60 = vld [vmem:[%s3258_s0 + $0xd8] sm:$0xff]  }
  0x14   :  { %v2098_v61 = vld [vmem:[%s3258_s0 + $0x1f8] sm:$0xff]   ;;  %v2099_v62 = vld [vmem:[%s3258_s0 + $0xe0] sm:$0xff]   ;;  %v2101_v0 = vld [vmem:[%s3258_s0 + $0xe8] sm:$0xff]  }
  0x15   :  { %v2100_v63 = vld [vmem:[%s3258_s0 + $0x200] sm:$0xff]   ;;  %v2102_v1 = vld [vmem:[%s3258_s0 + $0x208] sm:$0xff]   ;;  %v2103_v2 = vld [vmem:[%s3258_s0 + $0xf0] sm:$0xff]  }
  0x16   :  { %v2104_v3 = vld [vmem:[%s3258_s0 + $0x210] sm:$0xff]   ;;  %v2105_v4 = vld [vmem:[%s3258_s0 + $0xf8] sm:$0xff]   ;;  %v2107_v6 = vld [vmem:[%s3258_s0 + $0x100] sm:$0xff]  }
  0x17   :  { %v2106_v5 = vld [vmem:[%s3258_s0 + $0x218] sm:$0xff]   ;;  %v2108_v7 = vld [vmem:[%s3258_s0 + $0x220] sm:$0xff]   ;;  %v2109_v8 = vld [vmem:[%s3258_s0 + $0x108] sm:$0xff]  }
  0x18   :  { %v2110_v9 = vld [vmem:[%s3258_s0 + $0x228] sm:$0xff]   ;;  %v2111_v10 = vld [vmem:[%s3258_s0 + $0x110] sm:$0xff]   ;;  %v2113_v12 = vld [vmem:[%s3258_s0 + $0x118] sm:$0xff]  }
  0x19   :  { %v2112_v11 = vld [vmem:[%s3258_s0 + $0x230] sm:$0xff]   ;;  %v2114_v13 = vld [vmem:[%s3258_s0 + $0x238] sm:$0xff]  }
  0x1a   :  { %1901 = vmatmul.mubr.msk.bf16.gmra.mrb[8].mxu0 %vm541_vm2, %v2053_v16  ;;  %1973 = vmatmul.mubr.msk.bf16.gmra.mrb[8].mxu1 %vm541_vm2, %v2054_v17 }
  0x1b   :  { %1904 = vmatprep.mubr.msk.bf16.mxu0 %vm541_vm2, %v2055_v18  ;;  %1976 = vmatprep.mubr.msk.bf16.mxu1 %vm541_vm2, %v2056_v19 }
  0x22   :  { %1905 = vmatmul.mubr.msk.bf16.gmra.mrb[12].mxu0 %vm541_vm2, %v2057_v20  ;;  %1977 = vmatmul.mubr.msk.bf16.gmra.mrb[12].mxu1 %vm541_vm2, %v2058_v21 }
  0x23   :  { %1908 = vmatprep.mubr.msk.bf16.mxu0 %vm541_vm2, %v2059_v22  ;;  %1980 = vmatprep.mubr.msk.bf16.mxu1 %vm541_vm2, %v2060_v23 }
  0x2a   :  { %1909 = vmatmul.mubr.msk.bf16.gmra.mrb[16].mxu0 %vm541_vm2, %v2061_v24  ;;  %1981 = vmatmul.mubr.msk.bf16.gmra.mrb[16].mxu1 %vm541_vm2, %v2062_v25 }
  0x2b   :  { %1912 = vmatprep.mubr.msk.bf16.mxu0 %vm541_vm2, %v2063_v26  ;;  %1984 = vmatprep.mubr.msk.bf16.mxu1 %vm541_vm2, %v2064_v27 }
  0x32   :  { %1913 = vmatmul.mubr.msk.bf16.gmra.mrb[20].mxu0 %vm541_vm2, %v2065_v28  ;;  %1985 = vmatmul.mubr.msk.bf16.gmra.mrb[20].mxu1 %vm541_vm2, %v2066_v29 }
  0x33   :  { %1916 = vmatprep.mubr.msk.bf16.mxu0 %vm541_vm2, %v2067_v30  ;;  %1988 = vmatprep.mubr.msk.bf16.mxu1 %vm541_vm2, %v2068_v31 }
  0x3a   :  { %1917 = vmatmul.mubr.msk.bf16.gmra.mrb[24].mxu0 %vm541_vm2, %v2069_v32  ;;  %1989 = vmatmul.mubr.msk.bf16.gmra.mrb[24].mxu1 %vm541_vm2, %v2070_v33 }
  0x3b   :  { %1920 = vmatprep.mubr.msk.bf16.mxu0 %vm541_vm2, %v2071_v34  ;;  %1992 = vmatprep.mubr.msk.bf16.mxu1 %vm541_vm2, %v2072_v35 }
  0x42   :  { %1921 = vmatmul.mubr.msk.bf16.gmra.mrb[28].mxu0 %vm541_vm2, %v2073_v36  ;;  %1993 = vmatmul.mubr.msk.bf16.gmra.mrb[28].mxu1 %vm541_vm2, %v2074_v37 }
  0x43   :  { %1924 = vmatprep.mubr.msk.bf16.mxu0 %vm541_vm2, %v2075_v38  ;;  %1996 = vmatprep.mubr.msk.bf16.mxu1 %vm541_vm2, %v2076_v39 }
  0x4a   :  { %1925 = vmatmul.mubr.msk.bf16.gmra.mrb[32].mxu0 %vm541_vm2, %v2077_v40  ;;  %1997 = vmatmul.mubr.msk.bf16.gmra.mrb[32].mxu1 %vm541_vm2, %v2078_v41 }
  0x4b   :  { %1928 = vmatprep.mubr.msk.bf16.mxu0 %vm541_vm2, %v2079_v42  ;;  %2000 = vmatprep.mubr.msk.bf16.mxu1 %vm541_vm2, %v2080_v43 }
  0x52   :  { %1929 = vmatmul.mubr.msk.bf16.gmra.mrb[36].mxu0 %vm541_vm2, %v2081_v44  ;;  %2001 = vmatmul.mubr.msk.bf16.gmra.mrb[36].mxu1 %vm541_vm2, %v2082_v45 }
  0x53   :  { %1932 = vmatprep.mubr.msk.bf16.mxu0 %vm541_vm2, %v2083_v46  ;;  %2004 = vmatprep.mubr.msk.bf16.mxu1 %vm541_vm2, %v2084_v47 }
  0x5a   :  { %1933 = vmatmul.mubr.msk.bf16.gmra.mrb[40].mxu0 %vm541_vm2, %v2085_v48  ;;  %2005 = vmatmul.mubr.msk.bf16.gmra.mrb[40].mxu1 %vm541_vm2, %v2086_v49 }
  0x5b   :  { %1936 = vmatprep.mubr.msk.bf16.mxu0 %vm541_vm2, %v2087_v50  ;;  %2008 = vmatprep.mubr.msk.bf16.mxu1 %vm541_vm2, %v2088_v51 }
  0x62   :  { %1937 = vmatmul.mubr.msk.bf16.gmra.mrb[44].mxu0 %vm541_vm2, %v2089_v52  ;;  %2009 = vmatmul.mubr.msk.bf16.gmra.mrb[44].mxu1 %vm541_vm2, %v2090_v53 }
  0x63   :  { %1940 = vmatprep.mubr.msk.bf16.mxu0 %vm541_vm2, %v2091_v54  ;;  %2012 = vmatprep.mubr.msk.bf16.mxu1 %vm541_vm2, %v2092_v55 }
  0x6a   :  { %1941 = vmatmul.mubr.msk.bf16.gmra.mrb[48].mxu0 %vm541_vm2, %v2093_v56  ;;  %2013 = vmatmul.mubr.msk.bf16.gmra.mrb[48].mxu1 %vm541_vm2, %v2094_v57  ;;  %v2494_v56 = vld [vmem:[%s3259_s2] ss:$0 sm:$0xff] }
  0x6b   :  { %1944 = vmatprep.mubr.msk.bf16.mxu0 %vm541_vm2, %v2095_v58  ;;  %2016 = vmatprep.mubr.msk.bf16.mxu1 %vm541_vm2, %v2096_v59 }
  0x72   :  { %1945 = vmatmul.mubr.msk.bf16.gmra.mrb[52].mxu0 %vm541_vm2, %v2097_v60  ;;  %2017 = vmatmul.mubr.msk.bf16.gmra.mrb[52].mxu1 %vm541_vm2, %v2098_v61 }
  0x73   :  { %1948 = vmatprep.mubr.msk.bf16.mxu0 %vm541_vm2, %v2099_v62  ;;  %2020 = vmatprep.mubr.msk.bf16.mxu1 %vm541_vm2, %v2100_v63 }
  0x7a   :  { %1949 = vmatmul.mubr.msk.bf16.gmra.mrb[56].mxu0 %vm541_vm2, %v2101_v0  ;;  %2021 = vmatmul.mubr.msk.bf16.gmra.mrb[56].mxu1 %vm541_vm2, %v2102_v1 }
  0x7b   :  { %1952 = vmatprep.mubr.msk.bf16.mxu0 %vm541_vm2, %v2103_v2  ;;  %2024 = vmatprep.mubr.msk.bf16.mxu1 %vm541_vm2, %v2104_v3 }
  0x82   :  { %1953 = vmatmul.mubr.msk.bf16.gmra.mrb[60].mxu0 %vm541_vm2, %v2105_v4  ;;  %2025 = vmatmul.mubr.msk.bf16.gmra.mrb[60].mxu1 %vm541_vm2, %v2106_v5 }
  0x83   :  { %1956 = vmatprep.mubr.msk.bf16.mxu0 %vm541_vm2, %v2107_v6  ;;  %2028 = vmatprep.mubr.msk.bf16.mxu1 %vm541_vm2, %v2108_v7 }
  0x8a   :  { %1957 = vmatmul.mubr.msk.bf16.gmra.mrb[64].mxu0 %vm541_vm2, %v2109_v8  ;;  %2029 = vmatmul.mubr.msk.bf16.gmra.mrb[64].mxu1 %vm541_vm2, %v2110_v9 }
  0x8b   :  { %1960 = vmatprep.mubr.msk.bf16.mxu0 %vm541_vm2, %v2111_v10  ;;  %2032 = vmatprep.mubr.msk.bf16.mxu1 %vm541_vm2, %v2112_v11 }
  0x92   :  { %1961 = vmatmul.mubr.msk.bf16.gmra.mrb[68].mxu0 %vm541_vm2, %v2113_v12  ;;  %2033 = vmatmul.mubr.msk.bf16.gmra.mrb[68].mxu1 %vm541_vm2, %v2114_v13 }
  0xdd   :  { %v1894_v14 = vpop.f32.mrb[0].mxu0  ;;  %v1966_v15 = vpop.f32.mrb[0].mxu1 }
  0xde   :  { %v799_v16 = vpop.f32.mrb[1].mxu0  ;;  %v1087_v17 = vpop.f32.mrb[1].mxu1  ;;  %v2509_v63 = vadd.f32 %v1894_v14, %v2494_v56  ;;  %v2512_v0 = vadd.f32 %v1966_v15, %v2494_v56 }
  0xdf   :  { %v1895_v18 = vpop.f32.mrb[2].mxu0  ;;  %v1967_v19 = vpop.f32.mrb[2].mxu1  ;;  %v2515_v1 = vadd.f32 %v2494_v56, %v799_v16  ;;  %v2518_v2 = vadd.f32 %v2494_v56, %v1087_v17 }
  0xe0   :  { %v802_v20 = vpop.f32.mrb[3].mxu0  ;;  %v1090_v21 = vpop.f32.mrb[3].mxu1  ;;  %v2521_v3 = vadd.f32 %v1895_v18, %v2494_v56  ;;  %v2524_v4 = vadd.f32 %v1967_v19, %v2494_v56 }
  0xe1   :  { %v2527_v5 = vadd.f32 %v2494_v56, %v802_v20  ;;  %v2530_v6 = vadd.f32 %v2494_v56, %v1090_v21 }
  0xe5   :  { %v1898_v22 = vpop.f32.mrb[4].mxu0  ;;  %v1970_v23 = vpop.f32.mrb[4].mxu1 }
  0xe6   :  { %v815_v24 = vpop.f32.mrb[5].mxu0  ;;  %v1103_v25 = vpop.f32.mrb[5].mxu1  ;;  %v2543_v15 = vadd.f32 %v1898_v22, %v2494_v56  ;;  %v2546_v16 = vadd.f32 %v1970_v23, %v2494_v56 }
  0xe7   :  { %v2431_v26 = vpop.f32.mrb[6].mxu0  ;;  %v2433_v27 = vpop.f32.mrb[6].mxu1  ;;  %v2555_v21 = vadd.f32 %v2494_v56, %v815_v24  ;;  %v2558_v13 = vadd.f32 %v2494_v56, %v1103_v25 }
  0xe8   :  { %v2435_v28 = vpop.f32.mrb[7].mxu0  ;;  %v2437_v29 = vpop.f32.mrb[7].mxu1  ;;  %3285 = vst [vmem:[#allocation2_spill] sm:$0xff] %v2546_v16  ;;  %v2566_v23 = vadd.f32 %v2431_v26, %v2494_v56  ;;  %v2570_v10 = vadd.f32 %v2433_v27, %v2494_v56 }
  0xe9   :  { %3286 = vst [vmem:[#allocation3_spill] sm:$0xff] %v2555_v21  ;;  %3287 = vst [vmem:[#allocation4_spill] sm:$0xff] %v2558_v13  ;;  %v2574_v20 = vadd.f32 %v2494_v56, %v2435_v28  ;;  %v2578_v24 = vadd.f32 %v2494_v56, %v2437_v29 }
  0xed   :  { %v2439_v30 = vpop.f32.mrb[8].mxu0  ;;  %v2441_v31 = vpop.f32.mrb[8].mxu1 }
  0xee   :  { %v2443_v32 = vpop.f32.mrb[9].mxu0  ;;  %v2445_v33 = vpop.f32.mrb[9].mxu1  ;;  %v2586_v26 = vadd.f32 %v2439_v30, %v2494_v56  ;;  %v2590_v27 = vadd.f32 %v2441_v31, %v2494_v56 }
  0xef   :  { %v2447_v34 = vpop.f32.mrb[10].mxu0  ;;  %v2449_v35 = vpop.f32.mrb[10].mxu1  ;;  %v2594_v28 = vadd.f32 %v2494_v56, %v2443_v32  ;;  %v2598_v29 = vadd.f32 %v2494_v56, %v2445_v33 }
  0xf0   :  { %v2451_v36 = vpop.f32.mrb[11].mxu0  ;;  %v2453_v37 = vpop.f32.mrb[11].mxu1  ;;  %v2604_v30 = vadd.f32 %v2447_v34, %v2494_v56  ;;  %v2608_v31 = vadd.f32 %v2449_v35, %v2494_v56 }
  0xf1   :  { %v2614_v33 = vadd.f32 %v2494_v56, %v2451_v36  ;;  %v2618_v9 = vadd.f32 %v2494_v56, %v2453_v37 }
  0xf2   :  { %3288 = vst [vmem:[#allocation5_spill] sm:$0xff] %v2608_v31 }
  0xf3   :  { %3289 = vst [vmem:[#allocation6_spill] sm:$0xff] %v2614_v33  ;;  %3290 = vst [vmem:[#allocation7_spill] sm:$0xff] %v2618_v9 }
  0xf5   :  { %v2455_v38 = vpop.f32.mrb[12].mxu0  ;;  %v2457_v39 = vpop.f32.mrb[12].mxu1 }
  0xf6   :  { %v2459_v40 = vpop.f32.mrb[13].mxu0  ;;  %v2461_v41 = vpop.f32.mrb[13].mxu1  ;;  %v2636_v16 = vadd.f32 %v2455_v38, %v2494_v56  ;;  %v2640_v7 = vadd.f32 %v2457_v39, %v2494_v56 }
  0xf7   :  { %v2463_v42 = vpop.f32.mrb[14].mxu0  ;;  %v2465_v43 = vpop.f32.mrb[14].mxu1  ;;  %v2650_v8 = vadd.f32 %v2494_v56, %v2459_v40  ;;  %v2654_v38 = vadd.f32 %v2494_v56, %v2461_v41 }
  0xf8   :  { %v2467_v44 = vpop.f32.mrb[15].mxu0  ;;  %v2469_v45 = vpop.f32.mrb[15].mxu1  ;;  %3291 = vst [vmem:[#allocation8_spill] sm:$0xff] %v2640_v7  ;;  %v2662_v31 = vadd.f32 %v2463_v42, %v2494_v56  ;;  %v2666_v36 = vadd.f32 %v2465_v43, %v2494_v56 }
  0xf9   :  { %3292 = vst [vmem:[#allocation9_spill] sm:$0xff] %v2650_v8  ;;  %3293 = vst [vmem:[#allocation10_spill] sm:$0xff] %v2654_v38  ;;  %v2670_v40 = vadd.f32 %v2494_v56, %v2467_v44  ;;  %v2674_v41 = vadd.f32 %v2494_v56, %v2469_v45 }
  0xfd   :  { %v2471_v46 = vpop.f32.mrb[16].mxu0  ;;  %v2473_v47 = vpop.f32.mrb[16].mxu1 }
  0xfe   :  { %v2475_v48 = vpop.f32.mrb[17].mxu0  ;;  %v2477_v49 = vpop.f32.mrb[17].mxu1  ;;  %v2682_v42 = vadd.f32 %v2471_v46, %v2494_v56  ;;  %v2686_v43 = vadd.f32 %v2473_v47, %v2494_v56 }
  0xff   :  { %v2479_v50 = vpop.f32.mrb[18].mxu0  ;;  %v2481_v51 = vpop.f32.mrb[18].mxu1  ;;  %v2690_v44 = vadd.f32 %v2494_v56, %v2475_v48  ;;  %v2694_v45 = vadd.f32 %v2494_v56, %v2477_v49 }
 0x100   :  { %v2483_v52 = vpop.f32.mrb[19].mxu0  ;;  %v2485_v53 = vpop.f32.mrb[19].mxu1  ;;  %v2700_v46 = vadd.f32 %v2479_v50, %v2494_v56  ;;  %v2704_v47 = vadd.f32 %v2481_v51, %v2494_v56 }
 0x101   :  { %v2710_v49 = vadd.f32 %v2494_v56, %v2483_v52 }
 0x105   :  { %v2487_v54 = vpop.f32.mrb[20].mxu0  ;;  %v2489_v55 = vpop.f32.mrb[20].mxu1 }
 0x106   :  { %v2496_v57 = vpop.f32.mrb[21].mxu0  ;;  %v2498_v58 = vpop.f32.mrb[21].mxu1  ;;  %v2732_v7 = vadd.f32 %v2487_v54, %v2494_v56  ;;  %v2736_v33 = vadd.f32 %v2489_v55, %v2494_v56 }
 0x107   :  { %v2500_v59 = vpop.f32.mrb[22].mxu0  ;;  %v2502_v60 = vpop.f32.mrb[22].mxu1  ;;  %v2750_v54 = vadd.f32 %v2494_v56, %v2498_v58 }
 0x108   :  { %v2504_v61 = vpop.f32.mrb[23].mxu0  ;;  %v2506_v62 = vpop.f32.mrb[23].mxu1  ;;  %3296 = vst [vmem:[#allocation13_spill] sm:$0xff] %v2732_v7  ;;  %3297 = vst [vmem:[#allocation14_spill] sm:$0xff] %v2736_v33  ;;  %v2762_v52 = vadd.f32 %v2502_v60, %v2494_v56 }
 0x109   :  { %3300 = vst [vmem:[#allocation17_spill] sm:$0xff] %v2750_v54  ;;  %v2770_v58 = vadd.f32 %v2494_v56, %v2506_v62 }
 0x10a   :  { %3303 = vst [vmem:[#allocation20_spill] sm:$0xff] %v2762_v52 }
 0x10b   :  { %3305 = vst [vmem:[#allocation22_spill] sm:$0xff] %v2770_v58 }
 0x10d   :  { %v2536_v11 = vpop.f32.mrb[24].mxu0  ;;  %v2538_v12 = vpop.f32.mrb[24].mxu1 }
 0x10e   :  { %v2548_v17 = vpop.f32.mrb[25].mxu0  ;;  %v2550_v18 = vpop.f32.mrb[25].mxu1  ;;  %v2782_v60 = vadd.f32 %v2538_v12, %v2494_v56 }
 0x10f   :  { %v2560_v14 = vpop.f32.mrb[26].mxu0  ;;  %v2562_v22 = vpop.f32.mrb[26].mxu1  ;;  %v2790_v62 = vadd.f32 %v2494_v56, %v2550_v18 }
 0x110   :  { %v2580_v25 = vpop.f32.mrb[27].mxu0  ;;  %v2582_v19 = vpop.f32.mrb[27].mxu1  ;;  %3309 = vst [vmem:[#allocation26_spill] sm:$0xff] %v2782_v60  ;;  %v2800_v12 = vadd.f32 %v2562_v22, %v2494_v56 }
 0x111   :  { %3311 = vst [vmem:[#allocation28_spill] sm:$0xff] %v2790_v62  ;;  %v2806_v18 = vadd.f32 %v2494_v56, %v2580_v25 }
 0x112   :  { %3313 = vst [vmem:[#allocation30_spill] sm:$0xff] %v2800_v12 }
 0x113   :  { %3314 = vst [vmem:[#allocation31_spill] sm:$0xff] %v2806_v18 }
 0x115   :  { %v2628_v21 = vpop.f32.mrb[28].mxu0  ;;  %v2630_v37 = vpop.f32.mrb[28].mxu1 }
 0x116   :  { %v2642_v32 = vpop.f32.mrb[29].mxu0  ;;  %v2644_v13 = vpop.f32.mrb[29].mxu1 }
 0x117   :  { %v2656_v34 = vpop.f32.mrb[30].mxu0  ;;  %v2658_v39 = vpop.f32.mrb[30].mxu1 }
 0x118   :  { %v2676_v35 = vpop.f32.mrb[31].mxu0  ;;  %v2678_v9 = vpop.f32.mrb[31].mxu1 }
 0x119   :  { %3294 = vst [vmem:[#allocation11_spill] sm:$0xff] %v2676_v35  ;;  %3295 = vst [vmem:[#allocation12_spill] sm:$0xff] %v2678_v9  ;;  %v2714_v35 = vadd.f32 %v2494_v56, %v2485_v53  ;;  %v2746_v9 = vadd.f32 %v2494_v56, %v2496_v57  ;;  %v2766_v57 = vadd.f32 %v2494_v56, %v2504_v61 }
 0x11a   :  { %v2786_v61 = vadd.f32 %v2494_v56, %v2548_v17 }
 0x11b   :  { %3299 = vst [vmem:[#allocation16_spill] sm:$0xff] %v2746_v9  ;;  %3304 = vst [vmem:[#allocation21_spill] sm:$0xff] %v2766_v57 }
 0x11c   :  { %3310 = vst [vmem:[#allocation27_spill] sm:$0xff] %v2786_v61 }
 0x11d   :  { %v2724_v8 = vpop.f32.mrb[32].mxu0  ;;  %v2726_v53 = vpop.f32.mrb[32].mxu1 }
 0x11e   :  { %v2738_v48 = vpop.f32.mrb[33].mxu0  ;;  %v2740_v38 = vpop.f32.mrb[33].mxu1 }
 0x11f   :  { %3298 = vst [vmem:[#allocation15_spill] sm:$0xff] %v2738_v48  ;;  %v2752_v50 = vpop.f32.mrb[34].mxu0  ;;  %v2754_v55 = vpop.f32.mrb[34].mxu1  ;;  %v2758_v48 = vadd.f32 %v2500_v59, %v2494_v56  ;;  %v2778_v59 = vadd.f32 %v2536_v11, %v2494_v56  ;;  %v2796_v11 = vadd.f32 %v2560_v14, %v2494_v56 }
 0x120   :  { %3301 = vst [vmem:[#allocation18_spill] sm:$0xff] %v2752_v50  ;;  %3302 = vst [vmem:[#allocation19_spill] sm:$0xff] %v2754_v55  ;;  %v2772_v51 = vpop.f32.mrb[35].mxu0  ;;  %v2774_v50 = vpop.f32.mrb[35].mxu1 }
 0x121   :  { %3306 = vst [vmem:[#allocation23_spill] sm:$0xff] %v2772_v51  ;;  %3307 = vst [vmem:[#allocation24_spill] sm:$0xff] %v2774_v50  ;;  %v2810_v51 = vadd.f32 %v2494_v56, %v2582_v19 }
 0x122   :  { %3308 = vst [vmem:[#allocation25_spill] sm:$0xff] %v2778_v59  ;;  %3312 = vst [vmem:[#allocation29_spill] sm:$0xff] %v2796_v11 }
 0x123   :  { %3315 = vst [vmem:[#allocation32_spill] sm:$0xff] %v2810_v51 }
 0x125   :  { %v1930_v9 = vpop.f32.mrb[36].mxu0  ;;  %v2002_v19 = vpop.f32.mrb[36].mxu1 }
 0x126   :  { %v952_v50 = vadd.f32 %v1930_v9, %v2494_v56  ;;  %v1240_v22 = vadd.f32 %v2002_v19, %v2494_v56  ;;  %v943_v57 = vpop.f32.mrb[37].mxu0  ;;  %v1231_v33 = vpop.f32.mrb[37].mxu1 }
 0x127   :  { %v944_v25 = vadd.f32 %v2494_v56, %v943_v57  ;;  %v1232_v54 = vadd.f32 %v2494_v56, %v1231_v33  ;;  %v1931_v62 = vpop.f32.mrb[38].mxu0  ;;  %v2003_v61 = vpop.f32.mrb[38].mxu1  ;;  %v3316_v57 = vmax.f32 %v2509_v63, 0.0  ;;  %v3317_v33 = vmax.f32 %v2512_v0, 0.0 }
 0x128   :  { %v1412_v60 = vmax.f32 %v952_v50, 0.0  ;;  %v1484_v7 = vmax.f32 %v1240_v22, 0.0  ;;  %v955_v14 = vadd.f32 %v1931_v62, %v2494_v56  ;;  %v1243_v9 = vadd.f32 %v2003_v61, %v2494_v56  ;;  %v946_v12 = vpop.f32.mrb[39].mxu0  ;;  %v1234_v19 = vpop.f32.mrb[39].mxu1 }
 0x129   :  { %v1410_v11 = vmax.f32 %v944_v25, 0.0  ;;  %v1482_v59 = vmax.f32 %v1232_v54, 0.0  ;;  %v947_v55 = vadd.f32 %v2494_v56, %v946_v12  ;;  %v1235_v17 = vadd.f32 %v2494_v56, %v1234_v19 }
 0x12a   :  { %v1520_v51 = vmax.f32 %v3316_v57, %v1412_v60  ;;  %v1556_v18 = vmax.f32 %v3317_v33, %v1484_v7  ;;  %v1413_v50 = vmax.f32 %v955_v14, 0.0  ;;  %v1485_v22 = vmax.f32 %v1243_v9, 0.0 }
 0x12b   :  { %v3318_v62 = vmax.f32 %v2515_v1, 0.0  ;;  %v3319_v61 = vmax.f32 %v2518_v2, 0.0  ;;  %v1411_v25 = vmax.f32 %v947_v55, 0.0  ;;  %v1483_v54 = vmax.f32 %v1235_v17, 0.0 }
 0x12c   :  { %v2842_v12 = vadd.f32 %v2628_v21, %v2494_v56  ;;  %v1592_v19 = vmax.f32 %v1520_v51, %v1556_v18  ;;  %v3320_v63 = vmax.f32 %v2521_v3, 0.0  ;;  %v3321_v0 = vmax.f32 %v2524_v4, 0.0 }
 0x12d   :  { %v1518_v58 = vmax.f32 %v3318_v62, %v1410_v11  ;;  %v1554_v52 = vmax.f32 %v3319_v61, %v1482_v59  ;;  %v2850_v1 = vadd.f32 %v2630_v37, %v2494_v56  ;;  %v3322_v2 = vmax.f32 %v2527_v5, 0.0  ;;  %v1934_v21 = vpop.f32.mrb[40].mxu0  ;;  %v2006_v14 = vpop.f32.mrb[40].mxu1 }
 0x12e   :  { %v1521_v60 = vmax.f32 %v3320_v63, %v1413_v50  ;;  %v1557_v7 = vmax.f32 %v3321_v0, %v1485_v22  ;;  %v3323_v59 = vmax.f32 %v2530_v6, 0.0  ;;  %v2858_v3 = vadd.f32 %v2494_v56, %v2642_v32  ;;  %1629 = vst.msk [vmem:[%s3260_s3 + $0x10] sm:$0xff] %vm1626_vm3, %v1592_v19  ;;  %v959_v51 = vpop.f32.mrb[41].mxu0 }
 0x12f   :  { %v1590_v11 = vmax.f32 %v1518_v58, %v1554_v52  ;;  %v1519_v55 = vmax.f32 %v3322_v2, %v1411_v25  ;;  %v968_v37 = vadd.f32 %v1934_v21, %v2494_v56  ;;  %v1256_v5 = vadd.f32 %v2006_v14, %v2494_v56  ;;  %v1247_v52 = vpop.f32.mrb[41].mxu1  ;;  %v1935_v9 = vpop.f32.mrb[42].mxu0 }
 0x130   :  { %v1555_v17 = vmax.f32 %v3323_v59, %v1483_v54  ;;  %v1593_v4 = vmax.f32 %v1521_v60, %v1557_v7  ;;  %v2868_v6 = vadd.f32 %v2494_v56, %v2644_v13  ;;  %v960_v58 = vadd.f32 %v2494_v56, %v959_v51  ;;  %v2007_v57 = vpop.f32.mrb[42].mxu1  ;;  %v962_v62 = vpop.f32.mrb[43].mxu0  ;;  %v3325_v7 = vld [vmem:[#allocation2_spill] sm:$0xff] }
 0x131   :  { %1627 = vst.msk [vmem:[%s3260_s3] sm:$0xff] %vm1626_vm3, %v1590_v11  ;;  %v1248_v18 = vadd.f32 %v2494_v56, %v1247_v52  ;;  %v1416_v33 = vmax.f32 %v968_v37, 0.0  ;;  %v1488_v13 = vmax.f32 %v1256_v5, 0.0  ;;  %v971_v50 = vadd.f32 %v1935_v9, %v2494_v56  ;;  %v1250_v61 = vpop.f32.mrb[43].mxu1 }
 0x132   :  { %v1591_v32 = vmax.f32 %v1519_v55, %v1555_v17  ;;  %1630 = vst.msk [vmem:[%s3260_s3 + $0x18] sm:$0xff] %vm1626_vm3, %v1593_v4  ;;  %v1259_v22 = vadd.f32 %v2007_v57, %v2494_v56  ;;  %v1414_v25 = vmax.f32 %v960_v58, 0.0  ;;  %v963_v19 = vadd.f32 %v2494_v56, %v962_v62  ;;  %v3327_v17 = vld [vmem:[#allocation3_spill] sm:$0xff]  ;;  %v3329_v4 = vld [vmem:[#allocation4_spill] sm:$0xff] }
 0x133   :  { %v1486_v54 = vmax.f32 %v1248_v18, 0.0  ;;  %v1251_v63 = vadd.f32 %v2494_v56, %v1250_v61  ;;  %v3324_v60 = vmax.f32 %v2543_v15, 0.0  ;;  %v3326_v11 = vmax.f32 %v3325_v7, 0.0 }
 0x134   :  { %1628 = vst.msk [vmem:[%s3260_s3 + $0x8] sm:$0xff] %vm1626_vm3, %v1591_v32  ;;  %v1417_v55 = vmax.f32 %v971_v50, 0.0  ;;  %v1489_v59 = vmax.f32 %v1259_v22, 0.0  ;;  %v3328_v21 = vmax.f32 %v3327_v17, 0.0  ;;  %v3330_v37 = vmax.f32 %v3329_v4, 0.0 }
 0x135   :  { %v1524_v0 = vmax.f32 %v3324_v60, %v1416_v33  ;;  %v1560_v2 = vmax.f32 %v3326_v11, %v1488_v13  ;;  %v1415_v51 = vmax.f32 %v963_v19, 0.0  ;;  %v1487_v52 = vmax.f32 %v1251_v63, 0.0 }
 0x136   :  { %v1522_v14 = vmax.f32 %v3328_v21, %v1414_v25  ;;  %v1558_v5 = vmax.f32 %v3330_v37, %v1486_v54  ;;  %v1404_v32 = vmax.f32 %v2842_v12, 0.0  ;;  %v3331_v18 = vmax.f32 %v2566_v23, 0.0  ;;  %v1938_v25 = vpop.f32.mrb[44].mxu0  ;;  %v2010_v54 = vpop.f32.mrb[44].mxu1 }
 0x137   :  { %v1596_v58 = vmax.f32 %v1524_v0, %v1560_v2  ;;  %v3332_v9 = vmax.f32 %v2570_v10, 0.0  ;;  %v1476_v33 = vmax.f32 %v2850_v1, 0.0  ;;  %v3333_v50 = vmax.f32 %v2574_v20, 0.0  ;;  %v975_v63 = vpop.f32.mrb[45].mxu0  ;;  %v1263_v60 = vpop.f32.mrb[45].mxu1 }
 0x138   :  { %v1525_v15 = vmax.f32 %v3331_v18, %v1417_v55  ;;  %v1594_v13 = vmax.f32 %v1522_v14, %v1558_v5  ;;  %v3334_v62 = vmax.f32 %v2578_v24, 0.0  ;;  %v2908_v19 = vadd.f32 %v2656_v34, %v2494_v56  ;;  %v1939_v11 = vpop.f32.mrb[46].mxu0  ;;  %v2011_v2 = vpop.f32.mrb[46].mxu1 }
 0x139   :  { %v1561_v57 = vmax.f32 %v3332_v9, %v1489_v59  ;;  %v1523_v22 = vmax.f32 %v3333_v50, %v1415_v51  ;;  %1633 = vst.msk [vmem:[%s3260_s3 + $0x30] sm:$0xff] %vm1626_vm3, %v1596_v58  ;;  %v984_v23 = vadd.f32 %v1938_v25, %v2494_v56  ;;  %v1272_v20 = vadd.f32 %v2010_v54, %v2494_v56  ;;  %v978_v21 = vpop.f32.mrb[47].mxu0  ;;  %v1266_v14 = vpop.f32.mrb[47].mxu1 }
 0x13a   :  { %v1559_v61 = vmax.f32 %v3334_v62, %v1487_v52  ;;  %v2918_v24 = vadd.f32 %v2658_v39, %v2494_v56  ;;  %1631 = vst.msk [vmem:[%s3260_s3 + $0x20] sm:$0xff] %vm1626_vm3, %v1594_v13  ;;  %v976_v0 = vadd.f32 %v2494_v56, %v975_v63  ;;  %v1264_v7 = vadd.f32 %v2494_v56, %v1263_v60 }
 0x13b   :  { %v1597_v10 = vmax.f32 %v1525_v15, %v1561_v57  ;;  %v1420_v55 = vmax.f32 %v984_v23, 0.0  ;;  %v1492_v39 = vmax.f32 %v1272_v20, 0.0  ;;  %v987_v59 = vadd.f32 %v1939_v11, %v2494_v56  ;;  %v3340_v20 = vld [vmem:[#allocation5_spill] sm:$0xff]  ;;  %v3344_v11 = vld [vmem:[#allocation7_spill] sm:$0xff] }
 0x13c   :  { %v1595_v34 = vmax.f32 %v1523_v22, %v1559_v61  ;;  %v1275_v17 = vadd.f32 %v2011_v2, %v2494_v56  ;;  %v1418_v4 = vmax.f32 %v976_v0, 0.0  ;;  %v1490_v37 = vmax.f32 %v1264_v7, 0.0  ;;  %v3342_v0 = vld [vmem:[#allocation6_spill] sm:$0xff] }
 0x13d   :  { %1634 = vst.msk [vmem:[%s3260_s3 + $0x38] sm:$0xff] %vm1626_vm3, %v1597_v10  ;;  %v979_v5 = vadd.f32 %v2494_v56, %v978_v21  ;;  %v1267_v51 = vadd.f32 %v2494_v56, %v1266_v14  ;;  %v3335_v52 = vmax.f32 %v2586_v26, 0.0  ;;  %v3336_v18 = vmax.f32 %v2590_v27, 0.0 }
 0x13e   :  { %1632 = vst.msk [vmem:[%s3260_s3 + $0x28] sm:$0xff] %vm1626_vm3, %v1595_v34  ;;  %v1421_v9 = vmax.f32 %v987_v59, 0.0  ;;  %v1493_v57 = vmax.f32 %v1275_v17, 0.0  ;;  %v3337_v13 = vmax.f32 %v2594_v28, 0.0  ;;  %v3338_v22 = vmax.f32 %v2598_v29, 0.0  ;;  %v3346_v59 = vld [vmem:[#allocation11_spill] sm:$0xff] }
 0x13f   :  { %v1528_v58 = vmax.f32 %v3335_v52, %v1420_v55  ;;  %v1564_v15 = vmax.f32 %v3336_v18, %v1492_v39  ;;  %v1419_v61 = vmax.f32 %v979_v5, 0.0  ;;  %v1491_v25 = vmax.f32 %v1267_v51, 0.0  ;;  %v1942_v55 = vpop.f32.mrb[48].mxu0  ;;  %v2014_v39 = vpop.f32.mrb[48].mxu1  ;;  %v3347_v5 = vld [vmem:[#allocation12_spill] sm:$0xff] }
 0x140   :  { %v1526_v50 = vmax.f32 %v3337_v13, %v1418_v4  ;;  %v1562_v62 = vmax.f32 %v3338_v22, %v1490_v37  ;;  %v1402_v54 = vmax.f32 %v2858_v3, 0.0  ;;  %v3339_v23 = vmax.f32 %v2604_v30, 0.0  ;;  %v991_v4 = vpop.f32.mrb[49].mxu0  ;;  %v1279_v37 = vpop.f32.mrb[49].mxu1 }
 0x141   :  { %v1600_v10 = vmax.f32 %v1528_v58, %v1564_v15  ;;  %v3341_v63 = vmax.f32 %v3340_v20, 0.0  ;;  %v1474_v60 = vmax.f32 %v2868_v6, 0.0  ;;  %v3343_v28 = vmax.f32 %v3342_v0, 0.0  ;;  %v1943_v15 = vpop.f32.mrb[50].mxu0 }
 0x142   :  { %v1529_v26 = vmax.f32 %v3339_v23, %v1421_v9  ;;  %v1598_v34 = vmax.f32 %v1526_v50, %v1562_v62  ;;  %v3345_v29 = vmax.f32 %v3344_v11, 0.0  ;;  %v2958_v17 = vadd.f32 %v2494_v56, %v3346_v59  ;;  %v2015_v9 = vpop.f32.mrb[50].mxu1  ;;  %v994_v62 = vpop.f32.mrb[51].mxu0  ;;  %v3351_v11 = vld [vmem:[#allocation9_spill] sm:$0xff] }
 0x143   :  { %v1565_v27 = vmax.f32 %v3341_v63, %v1493_v57  ;;  %v1527_v7 = vmax.f32 %v3343_v28, %v1419_v61  ;;  %1637 = vst.msk [vmem:[%s3260_s3 + $0x50] sm:$0xff] %vm1626_vm3, %v1600_v10  ;;  %v1000_v21 = vadd.f32 %v1942_v55, %v2494_v56  ;;  %v1288_v14 = vadd.f32 %v2014_v39, %v2494_v56  ;;  %v1282_v61 = vpop.f32.mrb[51].mxu1  ;;  %v3353_v55 = vld [vmem:[#allocation10_spill] sm:$0xff] }
 0x144   :  { %v1563_v2 = vmax.f32 %v3345_v29, %v1491_v25  ;;  %v2968_v51 = vadd.f32 %v2494_v56, %v3347_v5  ;;  %1635 = vst.msk [vmem:[%s3260_s3 + $0x40] sm:$0xff] %vm1626_vm3, %v1598_v34  ;;  %v992_v58 = vadd.f32 %v2494_v56, %v991_v4  ;;  %v1280_v18 = vadd.f32 %v2494_v56, %v1279_v37 }
 0x145   :  { %v1601_v30 = vmax.f32 %v1529_v26, %v1565_v27  ;;  %v1424_v57 = vmax.f32 %v1000_v21, 0.0  ;;  %v1496_v13 = vmax.f32 %v1288_v14, 0.0  ;;  %v1003_v50 = vadd.f32 %v1943_v15, %v2494_v56  ;;  %v3349_v27 = vld [vmem:[#allocation8_spill] sm:$0xff] }
 0x146   :  { %v1599_v52 = vmax.f32 %v1527_v7, %v1563_v2  ;;  %v1291_v22 = vadd.f32 %v2015_v9, %v2494_v56  ;;  %v1422_v25 = vmax.f32 %v992_v58, 0.0  ;;  %v1494_v10 = vmax.f32 %v1280_v18, 0.0 }
 0x147   :  { %1638 = vst.msk [vmem:[%s3260_s3 + $0x58] sm:$0xff] %vm1626_vm3, %v1601_v30  ;;  %v995_v23 = vadd.f32 %v2494_v56, %v994_v62  ;;  %v1283_v26 = vadd.f32 %v2494_v56, %v1282_v61  ;;  %v3348_v20 = vmax.f32 %v2636_v16, 0.0  ;;  %v3350_v34 = vmax.f32 %v3349_v27, 0.0 }
 0x148   :  { %1636 = vst.msk [vmem:[%s3260_s3 + $0x48] sm:$0xff] %vm1626_vm3, %v1599_v52  ;;  %v1425_v28 = vmax.f32 %v1003_v50, 0.0  ;;  %v1497_v7 = vmax.f32 %v1291_v22, 0.0  ;;  %v3352_v29 = vmax.f32 %v3351_v11, 0.0  ;;  %v3354_v39 = vmax.f32 %v3353_v55, 0.0  ;;  %v1946_v50 = vpop.f32.mrb[52].mxu0 }
 0x149   :  { %v1532_v63 = vmax.f32 %v3348_v20, %v1424_v57  ;;  %v1568_v0 = vmax.f32 %v3350_v34, %v1496_v13  ;;  %v1423_v30 = vmax.f32 %v995_v23, 0.0  ;;  %v1495_v21 = vmax.f32 %v1283_v26, 0.0  ;;  %v2018_v22 = vpop.f32.mrb[52].mxu1 }
 0x14a   :  { %v1530_v2 = vmax.f32 %v3352_v29, %v1422_v25  ;;  %v1566_v59 = vmax.f32 %v3354_v39, %v1494_v10  ;;  %v1405_v14 = vmax.f32 %v2908_v19, 0.0  ;;  %v3355_v37 = vmax.f32 %v2662_v31, 0.0  ;;  %v1007_v25 = vpop.f32.mrb[53].mxu0 }
 0x14b   :  { %v1604_v4 = vmax.f32 %v1532_v63, %v1568_v0  ;;  %v3356_v5 = vmax.f32 %v2666_v36, 0.0  ;;  %v1477_v58 = vmax.f32 %v2918_v24, 0.0  ;;  %v3357_v15 = vmax.f32 %v2670_v40, 0.0  ;;  %v1295_v40 = vpop.f32.mrb[53].mxu1  ;;  %v1947_v20 = vpop.f32.mrb[54].mxu0 }
 0x14c   :  { %v1533_v16 = vmax.f32 %v3355_v37, %v1425_v28  ;;  %v1602_v18 = vmax.f32 %v1530_v2, %v1566_v59  ;;  %v3358_v57 = vmax.f32 %v2674_v41, 0.0  ;;  %v1403_v62 = vmax.f32 %v2958_v17, 0.0  ;;  %v2019_v63 = vpop.f32.mrb[54].mxu1 }
 0x14d   :  { %v1569_v52 = vmax.f32 %v3356_v5, %v1497_v7  ;;  %v1531_v9 = vmax.f32 %v3357_v15, %v1423_v30  ;;  %1641 = vst.msk [vmem:[%s3260_s3 + $0x70] sm:$0xff] %vm1626_vm3, %v1604_v4  ;;  %v1016_v36 = vadd.f32 %v1946_v50, %v2494_v56  ;;  %v1304_v61 = vadd.f32 %v2018_v22, %v2494_v56  ;;  %v1010_v7 = vpop.f32.mrb[55].mxu0  ;;  %v1298_v11 = vpop.f32.mrb[55].mxu1 }
 0x14e   :  { %v1567_v13 = vmax.f32 %v3358_v57, %v1495_v21  ;;  %v1475_v10 = vmax.f32 %v2968_v51, 0.0  ;;  %1639 = vst.msk [vmem:[%s3260_s3 + $0x60] sm:$0xff] %vm1626_vm3, %v1602_v18  ;;  %v1008_v23 = vadd.f32 %v2494_v56, %v1007_v25  ;;  %v1296_v26 = vadd.f32 %v2494_v56, %v1295_v40 }
 0x14f   :  { %v1605_v31 = vmax.f32 %v1533_v16, %v1569_v52  ;;  %v1428_v27 = vmax.f32 %v1016_v36, 0.0  ;;  %v1500_v34 = vmax.f32 %v1304_v61, 0.0  ;;  %v1019_v0 = vadd.f32 %v1947_v20, %v2494_v56 }
 0x150   :  { %v1603_v41 = vmax.f32 %v1531_v9, %v1567_v13  ;;  %v1307_v28 = vadd.f32 %v2019_v63, %v2494_v56  ;;  %v1426_v29 = vmax.f32 %v1008_v23, 0.0  ;;  %v1498_v2 = vmax.f32 %v1296_v26, 0.0  ;;  %v3367_v23 = vld [vmem:[#allocation15_spill] sm:$0xff] }
 0x151   :  { %1642 = vst.msk [vmem:[%s3260_s3 + $0x78] sm:$0xff] %vm1626_vm3, %v1605_v31  ;;  %v1011_v55 = vadd.f32 %v2494_v56, %v1010_v7  ;;  %v1299_v39 = vadd.f32 %v2494_v56, %v1298_v11  ;;  %v3359_v59 = vmax.f32 %v2682_v42, 0.0  ;;  %v3360_v21 = vmax.f32 %v2686_v43, 0.0 }
 0x152   :  { %1640 = vst.msk [vmem:[%s3260_s3 + $0x68] sm:$0xff] %vm1626_vm3, %v1603_v41  ;;  %v1429_v37 = vmax.f32 %v1019_v0, 0.0  ;;  %v1501_v16 = vmax.f32 %v1307_v28, 0.0  ;;  %v3361_v5 = vmax.f32 %v2690_v44, 0.0  ;;  %v3362_v18 = vmax.f32 %v2694_v45, 0.0  ;;  %v2022_v41 = vpop.f32.mrb[56].mxu1 }
 0x153   :  { %v1536_v30 = vmax.f32 %v3359_v59, %v1428_v27  ;;  %v1572_v4 = vmax.f32 %v3360_v21, %v1500_v34  ;;  %v1427_v9 = vmax.f32 %v1011_v55, 0.0  ;;  %v1499_v57 = vmax.f32 %v1299_v39, 0.0  ;;  %v1311_v20 = vpop.f32.mrb[57].mxu1 }
 0x154   :  { %v1534_v52 = vmax.f32 %v3361_v5, %v1426_v29  ;;  %v1570_v15 = vmax.f32 %v3362_v18, %v1498_v2  ;;  %v3042_v13 = vadd.f32 %v2724_v8, %v2494_v56  ;;  %v3363_v42 = vmax.f32 %v2700_v46, 0.0  ;;  %v1950_v8 = vpop.f32.mrb[56].mxu0  ;;  %v2023_v28 = vpop.f32.mrb[58].mxu1  ;;  %v3370_v5 = vld [vmem:[#allocation14_spill] sm:$0xff] }
 0x155   :  { %v1608_v50 = vmax.f32 %v1536_v30, %v1572_v4  ;;  %v3364_v43 = vmax.f32 %v2704_v47, 0.0  ;;  %v3050_v44 = vadd.f32 %v2726_v53, %v2494_v56  ;;  %v3365_v45 = vmax.f32 %v2710_v49, 0.0  ;;  %v1023_v26 = vpop.f32.mrb[57].mxu0  ;;  %v1314_v55 = vpop.f32.mrb[59].mxu1  ;;  %v3368_v4 = vld [vmem:[#allocation13_spill] sm:$0xff] }
 0x156   :  { %v1537_v22 = vmax.f32 %v3363_v42, %v1429_v37  ;;  %v1606_v36 = vmax.f32 %v1534_v52, %v1570_v15  ;;  %v3366_v25 = vmax.f32 %v2714_v35, 0.0  ;;  %v3058_v46 = vadd.f32 %v2494_v56, %v3367_v23  ;;  %v1951_v0 = vpop.f32.mrb[58].mxu0 }
 0x157   :  { %v1573_v31 = vmax.f32 %v3364_v43, %v1501_v16  ;;  %v1535_v61 = vmax.f32 %v3365_v45, %v1427_v9  ;;  %1645 = vst.msk [vmem:[%s3260_s3 + $0x90] sm:$0xff] %vm1626_vm3, %v1608_v50  ;;  %v1032_v53 = vadd.f32 %v1950_v8, %v2494_v56  ;;  %v1320_v49 = vadd.f32 %v2022_v41, %v2494_v56  ;;  %v1026_v2 = vpop.f32.mrb[59].mxu0  ;;  %v3377_v41 = vld [vmem:[#allocation20_spill] sm:$0xff] }
 0x158   :  { %v1571_v40 = vmax.f32 %v3366_v25, %v1499_v57  ;;  %v3068_v35 = vadd.f32 %v2494_v56, %v2740_v38  ;;  %1643 = vst.msk [vmem:[%s3260_s3 + $0x80] sm:$0xff] %vm1626_vm3, %v1606_v36  ;;  %v1024_v27 = vadd.f32 %v2494_v56, %v1023_v26  ;;  %v1312_v34 = vadd.f32 %v2494_v56, %v1311_v20  ;;  %v3372_v57 = vld [vmem:[#allocation16_spill] sm:$0xff]  ;;  %v3379_v26 = vld [vmem:[#allocation21_spill] sm:$0xff] }
 0x159   :  { %v1609_v47 = vmax.f32 %v1537_v22, %v1573_v31  ;;  %v1432_v7 = vmax.f32 %v1032_v53, 0.0  ;;  %v1504_v38 = vmax.f32 %v1320_v49, 0.0  ;;  %v1035_v11 = vadd.f32 %v1951_v0, %v2494_v56  ;;  %v3374_v22 = vld [vmem:[#allocation17_spill] sm:$0xff] }
 0x15a   :  { %v1607_v63 = vmax.f32 %v1535_v61, %v1571_v40  ;;  %v1323_v29 = vadd.f32 %v2023_v28, %v2494_v56  ;;  %v1430_v39 = vmax.f32 %v1024_v27, 0.0  ;;  %v1502_v59 = vmax.f32 %v1312_v34, 0.0  ;;  %v3381_v27 = vld [vmem:[#allocation22_spill] sm:$0xff]  ;;  %v1954_v28 = vpop.f32.mrb[60].mxu0 }
 0x15b   :  { %1646 = vst.msk [vmem:[%s3260_s3 + $0x98] sm:$0xff] %vm1626_vm3, %v1609_v47  ;;  %v1027_v30 = vadd.f32 %v2494_v56, %v1026_v2  ;;  %v1315_v21 = vadd.f32 %v2494_v56, %v1314_v55  ;;  %v3369_v37 = vmax.f32 %v3368_v4, 0.0  ;;  %v3371_v52 = vmax.f32 %v3370_v5, 0.0  ;;  %v1039_v55 = vpop.f32.mrb[61].mxu0 }
 0x15c   :  { %1644 = vst.msk [vmem:[%s3260_s3 + $0x88] sm:$0xff] %vm1626_vm3, %v1607_v63  ;;  %v1433_v15 = vmax.f32 %v1035_v11, 0.0  ;;  %v1505_v9 = vmax.f32 %v1323_v29, 0.0  ;;  %v3373_v50 = vmax.f32 %v3372_v57, 0.0  ;;  %v3375_v43 = vmax.f32 %v3374_v22, 0.0 }
 0x15d   :  { %v1540_v16 = vmax.f32 %v3369_v37, %v1432_v7  ;;  %v1576_v18 = vmax.f32 %v3371_v52, %v1504_v38  ;;  %v1431_v36 = vmax.f32 %v1027_v30, 0.0  ;;  %v1503_v45 = vmax.f32 %v1315_v21, 0.0  ;;  %v2026_v7 = vpop.f32.mrb[60].mxu1  ;;  %v3383_v38 = vld [vmem:[#allocation18_spill] sm:$0xff] }
 0x15e   :  { %v1538_v42 = vmax.f32 %v3373_v50, %v1430_v39  ;;  %v1574_v31 = vmax.f32 %v3375_v43, %v1502_v59  ;;  %v1408_v61 = vmax.f32 %v3042_v13, 0.0  ;;  %v3376_v40 = vmax.f32 %v2758_v48, 0.0  ;;  %v1327_v39 = vpop.f32.mrb[61].mxu1  ;;  %v3384_v59 = vld [vmem:[#allocation19_spill] sm:$0xff] }
 0x15f   :  { %v1612_v25 = vmax.f32 %v1540_v16, %v1576_v18  ;;  %v3378_v23 = vmax.f32 %v3377_v41, 0.0  ;;  %v1480_v53 = vmax.f32 %v3050_v44, 0.0  ;;  %v3380_v20 = vmax.f32 %v3379_v26, 0.0  ;;  %v1955_v16 = vpop.f32.mrb[62].mxu0  ;;  %v2027_v5 = vpop.f32.mrb[62].mxu1 }
 0x160   :  { %v1541_v8 = vmax.f32 %v3376_v40, %v1433_v15  ;;  %v1610_v49 = vmax.f32 %v1538_v42, %v1574_v31  ;;  %v3382_v34 = vmax.f32 %v3381_v27, 0.0  ;;  %v3108_v11 = vadd.f32 %v3383_v38, %v2494_v56  ;;  %v1042_v57 = vpop.f32.mrb[63].mxu0  ;;  %v1330_v50 = vpop.f32.mrb[63].mxu1  ;;  %v3387_v40 = vld [vmem:[#allocation26_spill] sm:$0xff] }
 0x161   :  { %v1577_v47 = vmax.f32 %v3378_v23, %v1505_v9  ;;  %v1539_v63 = vmax.f32 %v3380_v20, %v1431_v36  ;;  %1649 = vst.msk [vmem:[%s3260_s3 + $0xb0] sm:$0xff] %vm1626_vm3, %v1612_v25  ;;  %v1048_v29 = vadd.f32 %v1954_v28, %v2494_v56  ;;  %v1336_v2 = vadd.f32 %v2026_v7, %v2494_v56  ;;  %v3385_v36 = vld [vmem:[#allocation25_spill] sm:$0xff] }
 0x162   :  { %v1575_v0 = vmax.f32 %v3382_v34, %v1503_v45  ;;  %v3118_v30 = vadd.f32 %v3384_v59, %v2494_v56  ;;  %1647 = vst.msk [vmem:[%s3260_s3 + $0xa0] sm:$0xff] %vm1626_vm3, %v1610_v49  ;;  %v1040_v4 = vadd.f32 %v2494_v56, %v1039_v55  ;;  %v1328_v37 = vadd.f32 %v2494_v56, %v1327_v39  ;;  %v3389_v49 = vld [vmem:[#allocation27_spill] sm:$0xff]  ;;  %v3395_v55 = vld [vmem:[#allocation30_spill] sm:$0xff] }
 0x163   :  { %v1613_v48 = vmax.f32 %v1541_v8, %v1577_v47  ;;  %v1436_v52 = vmax.f32 %v1048_v29, 0.0  ;;  %v1508_v18 = vmax.f32 %v1336_v2, 0.0  ;;  %v1051_v15 = vadd.f32 %v1955_v16, %v2494_v56 }
 0x164   :  { %v1611_v21 = vmax.f32 %v1539_v63, %v1575_v0  ;;  %v1339_v9 = vadd.f32 %v2027_v5, %v2494_v56  ;;  %v1434_v42 = vmax.f32 %v1040_v4, 0.0  ;;  %v1506_v22 = vmax.f32 %v1328_v37, 0.0  ;;  %v3391_v63 = vld [vmem:[#allocation28_spill] sm:$0xff]  ;;  %v3397_v37 = vld [vmem:[#allocation31_spill] sm:$0xff] }
 0x165   :  { %1650 = vst.msk [vmem:[%s3260_s3 + $0xb8] sm:$0xff] %vm1626_vm3, %v1613_v48  ;;  %v1043_v43 = vadd.f32 %v2494_v56, %v1042_v57  ;;  %v1331_v31 = vadd.f32 %v2494_v56, %v1330_v50  ;;  %v3386_v45 = vmax.f32 %v3385_v36, 0.0  ;;  %v3388_v8 = vmax.f32 %v3387_v40, 0.0  ;;  %v3393_v48 = vld [vmem:[#allocation29_spill] sm:$0xff]  ;;  %v2030_v57 = vpop.f32.mrb[64].mxu1  ;;  %v3401_v50 = vld [vmem:[#allocation23_spill] sm:$0xff] }
 0x166   :  { %1648 = vst.msk [vmem:[%s3260_s3 + $0xa8] sm:$0xff] %vm1626_vm3, %v1611_v21  ;;  %v1437_v23 = vmax.f32 %v1051_v15, 0.0  ;;  %v1509_v47 = vmax.f32 %v1339_v9, 0.0  ;;  %v3390_v26 = vmax.f32 %v3389_v49, 0.0  ;;  %v3392_v27 = vmax.f32 %v3391_v63, 0.0  ;;  %v1958_v9 = vpop.f32.mrb[64].mxu0 }
 0x167   :  { %v1544_v25 = vmax.f32 %v3386_v45, %v1436_v52  ;;  %v1580_v41 = vmax.f32 %v3388_v8, %v1508_v18  ;;  %v1435_v0 = vmax.f32 %v1043_v43, 0.0  ;;  %v1507_v28 = vmax.f32 %v1331_v31, 0.0  ;;  %v3399_v52 = vld [vmem:[#allocation32_spill] sm:$0xff]  ;;  %v1055_v36 = vpop.f32.mrb[65].mxu0  ;;  %v1343_v45 = vpop.f32.mrb[65].mxu1 }
 0x168   :  { %v1542_v20 = vmax.f32 %v3390_v26, %v1434_v42  ;;  %v1578_v34 = vmax.f32 %v3392_v27, %v1506_v22  ;;  %v1406_v7 = vmax.f32 %v3058_v46, 0.0  ;;  %v3394_v29 = vmax.f32 %v3393_v48, 0.0  ;;  %v2031_v49 = vpop.f32.mrb[66].mxu1 }
 0x169   :  { %v1616_v38 = vmax.f32 %v1544_v25, %v1580_v41  ;;  %v3396_v39 = vmax.f32 %v3395_v55, 0.0  ;;  %v1478_v21 = vmax.f32 %v3068_v35, 0.0  ;;  %v3398_v16 = vmax.f32 %v3397_v37, 0.0  ;;  %v3402_v25 = vld [vmem:[#allocation24_spill] sm:$0xff] }
 0x16a   :  { %v1545_v2 = vmax.f32 %v3394_v29, %v1437_v23  ;;  %v1614_v4 = vmax.f32 %v1542_v20, %v1578_v34  ;;  %v3400_v18 = vmax.f32 %v3399_v52, 0.0  ;;  %v3158_v42 = vadd.f32 %v2494_v56, %v3401_v50 }
 0x16b   :  { %v1581_v59 = vmax.f32 %v3396_v39, %v1509_v47  ;;  %v1543_v5 = vmax.f32 %v3398_v16, %v1435_v0  ;;  %1653 = vst.msk [vmem:[%s3260_s3 + $0xd0] sm:$0xff] %vm1626_vm3, %v1616_v38  ;;  %v1064_v43 = vadd.f32 %v1958_v9, %v2494_v56  ;;  %v1352_v31 = vadd.f32 %v2030_v57, %v2494_v56  ;;  %v1959_v47 = vpop.f32.mrb[66].mxu0  ;;  %v1346_v0 = vpop.f32.mrb[67].mxu1 }
 0x16c   :  { %v1579_v15 = vmax.f32 %v3400_v18, %v1507_v28  ;;  %v3168_v40 = vadd.f32 %v2494_v56, %v3402_v25  ;;  %1651 = vst.msk [vmem:[%s3260_s3 + $0xc0] sm:$0xff] %vm1626_vm3, %v1614_v4  ;;  %v1056_v41 = vadd.f32 %v2494_v56, %v1055_v36  ;;  %v1344_v23 = vadd.f32 %v2494_v56, %v1343_v45  ;;  %v1058_v34 = vpop.f32.mrb[67].mxu0  ;;  %v2115_v25 = vld [vmem:[%s3259_s2] ss:$0 sm:$0xff] }
 0x16d   :  { %v1617_v22 = vmax.f32 %v1545_v2, %v1581_v59  ;;  %v1440_v26 = vmax.f32 %v1064_v43, 0.0  ;;  %v1512_v20 = vmax.f32 %v1352_v31, 0.0  ;;  %v1067_v63 = vadd.f32 %v1959_v47, %v2494_v56 }
 0x16e   :  { %v1615_v8 = vmax.f32 %v1543_v5, %v1579_v15  ;;  %v1355_v27 = vadd.f32 %v2031_v49, %v2494_v56  ;;  %v1438_v28 = vmax.f32 %v1056_v41, 0.0  ;;  %v1510_v38 = vmax.f32 %v1344_v23, 0.0 }
 0x16f   :  { %1654 = vst.msk [vmem:[%s3260_s3 + $0xd8] sm:$0xff] %vm1626_vm3, %v1617_v22  ;;  %v1059_v48 = vadd.f32 %v2494_v56, %v1058_v34  ;;  %v1347_v29 = vadd.f32 %v2494_v56, %v1346_v0  ;;  %v1548_v2 = vmax.f32 %v1404_v32, %v1440_v26  ;;  %v1584_v55 = vmax.f32 %v1476_v33, %v1512_v20 }
 0x170   :  { %1652 = vst.msk [vmem:[%s3260_s3 + $0xc8] sm:$0xff] %vm1626_vm3, %v1615_v8  ;;  %v1441_v39 = vmax.f32 %v1067_v63, 0.0  ;;  %v1513_v59 = vmax.f32 %v1355_v27, 0.0  ;;  %v1546_v4 = vmax.f32 %v1402_v54, %v1438_v28  ;;  %v1582_v37 = vmax.f32 %v1474_v60, %v1510_v38  ;;  %v1962_v54 = vpop.f32.mrb[68].mxu0  ;;  %v2034_v60 = vpop.f32.mrb[68].mxu1 }
 0x171   :  { %v1439_v16 = vmax.f32 %v1059_v48, 0.0  ;;  %v1511_v5 = vmax.f32 %v1347_v29, 0.0  ;;  %v1409_v52 = vmax.f32 %v3108_v11, 0.0  ;;  %v1620_v18 = vmax.f32 %v1548_v2, %v1584_v55  ;;  %v1359_v17 = vpop.f32.mrb[69].mxu1 }
 0x172   :  { %v1549_v12 = vmax.f32 %v1405_v14, %v1441_v39  ;;  %v1585_v1 = vmax.f32 %v1477_v58, %v1513_v59  ;;  %v1481_v32 = vmax.f32 %v3118_v30, 0.0  ;;  %v1618_v33 = vmax.f32 %v1546_v4, %v1582_v37  ;;  %v1071_v58 = vpop.f32.mrb[69].mxu0  ;;  %v2035_v9 = vpop.f32.mrb[70].mxu1 }
 0x173   :  { %v1547_v3 = vmax.f32 %v1403_v62, %v1439_v16  ;;  %v1583_v6 = vmax.f32 %v1475_v10, %v1511_v5  ;;  %v1407_v11 = vmax.f32 %v3158_v42, 0.0  ;;  %1657 = vst.msk [vmem:[%s3260_s3 + $0xf0] sm:$0xff] %vm1626_vm3, %v1620_v18  ;;  %v1080_v24 = vadd.f32 %v1962_v54, %v2494_v56  ;;  %v1963_v15 = vpop.f32.mrb[70].mxu0  ;;  %v1362_v31 = vpop.f32.mrb[71].mxu1 }
 0x174   :  { %v1621_v19 = vmax.f32 %v1549_v12, %v1585_v1  ;;  %v1368_v14 = vadd.f32 %v2034_v60, %v2494_v56  ;;  %v1479_v62 = vmax.f32 %v3168_v40, 0.0  ;;  %1655 = vst.msk [vmem:[%s3260_s3 + $0xe0] sm:$0xff] %vm1626_vm3, %v1618_v33  ;;  %v1072_v10 = vadd.f32 %v2494_v56, %v1071_v58  ;;  %v1074_v43 = vpop.f32.mrb[71].mxu0 }
 0x175   :  { %v1619_v51 = vmax.f32 %v1547_v3, %v1583_v6  ;;  %v1360_v30 = vadd.f32 %v2494_v56, %v1359_v17  ;;  %v1444_v57 = vmax.f32 %v1080_v24, 0.0  ;;  %v1083_v42 = vadd.f32 %v1963_v15, %v2494_v56 }
 0x176   :  { %1658 = vst.msk [vmem:[%s3260_s3 + $0xf8] sm:$0xff] %vm1626_vm3, %v1621_v19  ;;  %v1516_v50 = vmax.f32 %v1368_v14, 0.0  ;;  %v1371_v22 = vadd.f32 %v2035_v9, %v2494_v56  ;;  %v1442_v36 = vmax.f32 %v1072_v10, 0.0  ;;  %v1075_v40 = vadd.f32 %v2115_v25, %v1074_v43 }
 0x177   :  { %1656 = vst.msk [vmem:[%s3260_s3 + $0xe8] sm:$0xff] %vm1626_vm3, %v1619_v51  ;;  %v1514_v45 = vmax.f32 %v1360_v30, 0.0  ;;  %v1363_v8 = vadd.f32 %v2115_v25, %v1362_v31  ;;  %v1552_v41 = vmax.f32 %v1408_v61, %v1444_v57  ;;  %v1445_v23 = vmax.f32 %v1083_v42, 0.0 }
 0x178   :  { %v1588_v56 = vmax.f32 %v1480_v53, %v1516_v50  ;;  %v1517_v47 = vmax.f32 %v1371_v22, 0.0  ;;  %v1550_v49 = vmax.f32 %v1406_v7, %v1442_v36  ;;  %v1443_v20 = vmax.f32 %v1075_v40, 0.0 }
 0x179   :  { %v1586_v26 = vmax.f32 %v1478_v21, %v1514_v45  ;;  %v1515_v63 = vmax.f32 %v1363_v8, 0.0  ;;  %v1553_v34 = vmax.f32 %v1409_v52, %v1445_v23 }
 0x17a   :  { %v1624_v27 = vmax.f32 %v1552_v41, %v1588_v56  ;;  %v1589_v0 = vmax.f32 %v1481_v32, %v1517_v47  ;;  %v1551_v38 = vmax.f32 %v1407_v11, %v1443_v20 }
 0x17b   :  { %v1622_v28 = vmax.f32 %v1550_v49, %v1586_v26  ;;  %v1587_v13 = vmax.f32 %v1479_v62, %v1515_v63 }
 0x17c   :  { %1661 = vst.msk [vmem:[%s3260_s3 + $0x110] sm:$0xff] %vm1626_vm3, %v1624_v27  ;;  %v1625_v44 = vmax.f32 %v1553_v34, %v1589_v0 }
 0x17d   :  { %1659 = vst.msk [vmem:[%s3260_s3 + $0x100] sm:$0xff] %vm1626_vm3, %v1622_v28  ;;  %v1623_v46 = vmax.f32 %v1551_v38, %v1587_v13 }
 0x17e   :  { %1662 = vst.msk [vmem:[%s3260_s3 + $0x118] sm:$0xff] %vm1626_vm3, %v1625_v44 }
 0x17f   :  { %1660 = vst.msk [vmem:[%s3260_s3 + $0x108] sm:$0xff] %vm1626_vm3, %v1623_v46 }

// kernel: net_forward.3
= control target key start
LH: loop header
LB: loop body
LE: loop exit
PB: predicated region body
PF: predicated region fallthrough
CT: control target
= control target key end

     0   :  { %vm118_vm0 = vcmask 408576   ;;  %vm143_vm1 = vcmask 1040384   ;;  %vm272_vm2 = vcmask 130048   ;;  %s832_s24 = smov 48   ;;  %s833_s25 = smov 16   ;;  %vm350_vm3 = vcmask 261120   ;;  %s1011_s1 = inlined_call_operand.vmem [shape: bf16[50,16], index: 1, kind: input, shape index: {}]   ;;  %s1012_s0 = inlined_call_operand.vmem [shape: bf16[128,50], index: 0, kind: input, shape index: {}]   ;;  %s1013_s3 = inlined_call_operand.vmem [shape: bf16[256,64], index: 3, kind: input, shape index: {}]   ;;  %s1014_s2 = inlined_call_operand.vmem [shape: f32[1,16], index: 2, kind: input, shape index: {}]   ;;  %s1015_s5 = inlined_call_operand.vmem [shape: bf16[64,2], index: 5, kind: input, shape index: {}]   ;;  %s1016_s4 = inlined_call_operand.vmem [shape: f32[1,64], index: 4, kind: input, shape index: {}]   ;;  %s1017_s6 = inlined_call_operand.vmem [shape: f32[1,2], index: 6, kind: input, shape index: {}]   ;;  %s1018_s7 = inlined_call_operand.vmem [shape: f32[2,2], index: 7, kind: output, shape index: {}]  }
   0x1   :  { %v800_v0 = vld [vmem:[%s1011_s1] sm:$0xff]   ;;  %v801_v1 = vld [vmem:[%s1011_s1 + $0x8] sm:$0xff]   ;;  %v802_v2 = vld [vmem:[%s1011_s1 + $0x10] sm:$0xff]   ;;  %s835_s9 = smov 32   ;;  %s837_s14 = smov 96   ;;  %vm352_vm4 = vcmask 392192  }
   0x2   :  { %719 = vmatprep.subr.bf16.mxu0 %v800_v0  ;;  %v804_v3 = vld [vmem:[%s1012_s0] sm:$0xff]   ;;  %v803_v4 = vld [vmem:[%s1011_s1 + $0x18] ss:$0 sps:$4 sm:$0x11]   ;;  %v805_v6 = vld [vmem:[%s1012_s0 + $0x8] sm:$0xff]   ;;  %s838_s1 = smov 80  }
   0x3   :  { %720 = vmatpush3.bf16.msra.mxu0 %v800_v0  ;;  %727 = vmatprep.mubr.msk.bf16.mxu0 %vm118_vm0, %v804_v3  ;;  %v145_v5 = vsel %vm143_vm1, %v803_v4, 0  ;;  %v806_v7 = vld [vmem:[%s1012_s0 + $0x10] sm:$0xff]   ;;  %v807_v8 = vld [vmem:[%s1012_s0 + $0x18] sm:$0xff]   ;;  %v808_v9 = vld [vmem:[%s1012_s0 + $0x20] sm:$0xff]   ;;  %vm354_vm5 = vcmask 523264   ;;  %vm356_vm6 = vcmask 654336  }
   0x4   :  { %721 = vmatprep.subr.bf16.mxu0 %v801_v1  ;;  %v809_v10 = vld [vmem:[%s1012_s0 + $0x28] sm:$0xff]   ;;  %v810_v11 = vld [vmem:[%s1012_s0 + $0x30] sm:$0xff]   ;;  %v811_v12 = vld [vmem:[%s1012_s0 + $0x38] sm:$0xff]   ;;  %s834_s0 = smov 64   ;;  %vm358_vm7 = vcmask 785408   ;;  %vm360_vm8 = vcmask 916480  }
   0x5   :  { %v812_v13 = vld [vmem:[%s1013_s3 + $0x40] sm:$0xff]   ;;  %v814_v15 = vld [vmem:[%s1013_s3 + $0x48] sm:$0xff]   ;;  %v816_v17 = vld [vmem:[%s1013_s3 + $0x50] sm:$0xff]   ;;  %vm840_vm9 = vmmov 0   ;;  %vm630_vm10 = vcmask 9216  }
   0x6   :  { %v813_v14 = vld [vmem:[%s1013_s3] sm:$0xff]   ;;  %692 = vmatprep.subr.bf16.mxu1 %v812_v13  ;;  %v815_v16 = vld [vmem:[%s1013_s3 + $0x8] sm:$0xff]   ;;  %v817_v18 = vld [vmem:[%s1013_s3 + $0x10] sm:$0xff]  }
   0x7   :  { %722 = vmatpush3.bf16.msra.mxu0 %v801_v1  ;;  %693 = vmatpush3.bf16.msra.mxu1 %v813_v14  ;;  %v818_v19 = vld [vmem:[%s1013_s3 + $0x58] sm:$0xff]   ;;  %v636_v25 = vld [vmem:[%s1014_s2] ss:$0 sm:$0xff] }
   0x8   :  { %723 = vmatprep.subr.bf16.mxu0 %v802_v2  ;;  %694 = vmatprep.subr.bf16.mxu1 %v814_v15  ;;  %v819_v20 = vld [vmem:[%s1013_s3 + $0x18] sm:$0xff]  }
   0xb   :  { %724 = vmatpush3.bf16.msra.mxu0 %v802_v2  ;;  %695 = vmatpush3.bf16.msra.mxu1 %v815_v16 }
   0xc   :  { %755 = vmatprep.subr.msk.bf16.mxu0 %vm143_vm1, %v803_v4  ;;  %696 = vmatprep.subr.bf16.mxu1 %v816_v17  ;;  %v820_v17 = vld [vmem:[%s1013_s3 + $0x60] sm:$0xff]  }
   0xf   :  { %726 = vmatpush3.bf16.msra.mxu0 %v145_v5  ;;  %697 = vmatpush3.bf16.msra.mxu1 %v817_v18  ;;  %v821_v18 = vld [vmem:[%s1013_s3 + $0x20] sm:$0xff]  }
  0x10   :  { %698 = vmatprep.subr.bf16.mxu1 %v818_v19 }
  0x12   :  { %728 = vmatmul.mubr.msk.bf16.vlgmr.msra.gmra.mrb[0].mxu0 %vm118_vm0, %v805_v6 }
  0x13   :  { %731 = vmatprep.mubr.msk.bf16.mxu0 %vm118_vm0, %v806_v7  ;;  %699 = vmatpush3.bf16.msra.mxu1 %v819_v20  ;;  %v822_v20 = vld [vmem:[%s1013_s3 + $0x68] sm:$0xff]  }
  0x14   :  { %700 = vmatprep.subr.bf16.mxu1 %v820_v17 }
  0x17   :  { %701 = vmatpush3.bf16.msra.mxu1 %v821_v18 }
  0x18   :  { %702 = vmatprep.subr.bf16.mxu1 %v822_v20 }
  0x1a   :  { %732 = vmatmul.mubr.msk.bf16.gmra.mrb[4].mxu0 %vm118_vm0, %v807_v8 }
  0x1b   :  { %735 = vmatprep.mubr.msk.bf16.mxu0 %vm118_vm0, %v808_v9 }
  0x22   :  { %736 = vmatmul.mubr.msk.bf16.gmra.mrb[8].mxu0 %vm118_vm0, %v809_v10 }
  0x23   :  { %739 = vmatprep.mubr.msk.bf16.mxu0 %vm118_vm0, %v810_v11 }
  0x2a   :  { %740 = vmatmul.mubr.msk.bf16.gmra.mrb[12].mxu0 %vm118_vm0, %v811_v12 }
  0xe5   :  { %v729_v21 = vpop.f32.mrb[0].mxu0 }
  0xe6   :  { %v181_v22 = vpop.f32.mrb[1].mxu0  ;;  %v190_v26 = vadd.f32 %v729_v21, %v636_v25  ;;  %v823_v21 = vld [vmem:[%s1013_s3 + $0x28] sm:$0xff]  }
  0xe7   :  { %v730_v23 = vpop.f32.mrb[2].mxu0  ;;  %v182_v27 = vadd.f32 %v636_v25, %v181_v22  ;;  %703 = vmatpush3.bf16.msra.mxu1 %v823_v21 }
  0xe8   :  { %v184_v24 = vpop.f32.mrb[3].mxu0  ;;  %v193_v29 = vadd.f32 %v730_v23, %v636_v25  ;;  %v246_v35 = vmax.f32 %v190_v26, 0.0 }
  0xe9   :  { %v185_v32 = vadd.f32 %v636_v25, %v184_v24  ;;  %v244_v39 = vmax.f32 %v182_v27, 0.0 }
  0xea   :  { %v247_v42 = vmax.f32 %v193_v29, 0.0 }
  0xeb   :  { %v245_v45 = vmax.f32 %v185_v32, 0.0  ;;  %v824_v32 = vld [vmem:[%s1013_s3 + $0x70] sm:$0xff]  }
  0xec   :  { %704 = vmatprep.subr.bf16.mxu1 %v824_v32 }
  0xed   :  { %v733_v28 = vpop.f32.mrb[4].mxu0 }
  0xee   :  { %v206_v30 = vadd.f32 %v733_v28, %v636_v25  ;;  %v197_v31 = vpop.f32.mrb[5].mxu0 }
  0xef   :  { %v198_v33 = vadd.f32 %v636_v25, %v197_v31  ;;  %v734_v34 = vpop.f32.mrb[6].mxu0 }
  0xf0   :  { %v250_v36 = vmax.f32 %v206_v30, 0.0  ;;  %v209_v37 = vadd.f32 %v734_v34, %v636_v25  ;;  %v200_v38 = vpop.f32.mrb[7].mxu0 }
  0xf1   :  { %v248_v40 = vmax.f32 %v198_v33, 0.0  ;;  %v201_v41 = vadd.f32 %v636_v25, %v200_v38  ;;  %v825_v33 = vld [vmem:[%s1013_s3 + $0x30] sm:$0xff]  }
  0xf2   :  { %v262_v43 = vmax.f32 %v246_v35, %v250_v36  ;;  %v251_v44 = vmax.f32 %v209_v37, 0.0  ;;  %v826_v37 = vld [vmem:[%s1013_s3 + $0x78] sm:$0xff]   ;;  %705 = vmatpush3.bf16.msra.mxu1 %v825_v33 }
  0xf3   :  { %v260_v46 = vmax.f32 %v244_v39, %v248_v40  ;;  %v249_v47 = vmax.f32 %v201_v41, 0.0  ;;  %706 = vmatprep.subr.bf16.mxu1 %v826_v37 }
  0xf4   :  { %v263_v48 = vmax.f32 %v247_v42, %v251_v44  ;;  %v827_v42 = vld [vmem:[%s1013_s3 + $0x38] sm:$0xff]   ;;  %s839_s3 = smov 112  }
  0xf5   :  { %v261_v49 = vmax.f32 %v245_v45, %v249_v47  ;;  %v737_v50 = vpop.f32.mrb[8].mxu0  ;;  %v836_v45 = vmov 0.0  }
  0xf6   :  { %v213_v51 = vpop.f32.mrb[9].mxu0  ;;  %v222_v54 = vadd.f32 %v737_v50, %v636_v25  ;;  %743 = vmatprep.subr.bf16.mxu0 %v836_v45  ;;  %707 = vmatpush3.bf16.msra.mxu1 %v827_v42  ;;  %v830_v50 = vld [vmem:[%s1015_s5 + $0x10] sm:$0xff]  }
  0xf7   :  { %v738_v52 = vpop.f32.mrb[10].mxu0  ;;  %v214_v55 = vadd.f32 %v636_v25, %v213_v51  ;;  %751 = vmatprep.mubr.msk.bf16.mxu0 %vm840_vm9, %v836_v45 }
  0xf8   :  { %v216_v53 = vpop.f32.mrb[11].mxu0  ;;  %v225_v57 = vadd.f32 %v738_v52, %v636_v25  ;;  %v254_v63 = vmax.f32 %v222_v54, 0.0 }
  0xf9   :  { %v217_v60 = vadd.f32 %v636_v25, %v216_v53  ;;  %v252_v3 = vmax.f32 %v214_v55, 0.0 }
  0xfa   :  { %v255_v6 = vmax.f32 %v225_v57, 0.0 }
  0xfb   :  { %v253_v9 = vmax.f32 %v217_v60, 0.0 }
  0xfd   :  { %v741_v56 = vpop.f32.mrb[12].mxu0 }
  0xfe   :  { %v238_v58 = vadd.f32 %v741_v56, %v636_v25  ;;  %v229_v59 = vpop.f32.mrb[13].mxu0 }
  0xff   :  { %v230_v61 = vadd.f32 %v636_v25, %v229_v59  ;;  %v742_v62 = vpop.f32.mrb[14].mxu0 }
 0x100   :  { %v258_v0 = vmax.f32 %v238_v58, 0.0  ;;  %v241_v1 = vadd.f32 %v742_v62, %v636_v25  ;;  %v232_v2 = vpop.f32.mrb[15].mxu0 }
 0x101   :  { %v256_v4 = vmax.f32 %v230_v61, 0.0  ;;  %v233_v5 = vadd.f32 %v636_v25, %v232_v2 }
 0x102   :  { %v266_v7 = vmax.f32 %v254_v63, %v258_v0  ;;  %v259_v8 = vmax.f32 %v241_v1, 0.0 }
 0x103   :  { %v264_v10 = vmax.f32 %v252_v3, %v256_v4  ;;  %v257_v11 = vmax.f32 %v233_v5, 0.0 }
 0x104   :  { %v270_v12 = vmax.f32 %v262_v43, %v266_v7  ;;  %v267_v13 = vmax.f32 %v255_v6, %v259_v8 }
 0x105   :  { %v268_v14 = vmax.f32 %v260_v46, %v264_v10  ;;  %v265_v15 = vmax.f32 %v253_v9, %v257_v11  ;;  %v828_v46 = vld [vmem:[%s1015_s5] sm:$0xff]  }
 0x106   :  { %275 = vst.msk [vmem:[#allocation2 + $0x10] sm:$0xff] %vm272_vm2, %v270_v12  ;;  %v271_v16 = vmax.f32 %v263_v48, %v267_v13  ;;  %744 = vmatpush3.bf16.msra.mxu0 %v828_v46  ;;  %v829_v48 = vld [vmem:[%s1015_s5 + $0x8] sm:$0xff]  }
 0x107   :  { %273 = vst.msk [vmem:[#allocation2] sm:$0xff] %vm272_vm2, %v268_v14  ;;  %v269_v19 = vmax.f32 %v261_v49, %v265_v15  ;;  %745 = vmatprep.subr.bf16.mxu0 %v836_v45 }
 0x108   :  { %276 = vst.msk [vmem:[#allocation2 + $0x18] sm:$0xff] %vm272_vm2, %v271_v16 }
 0x109   :  { %274 = vst.msk [vmem:[#allocation2 + $0x8] sm:$0xff] %vm272_vm2, %v269_v19 }
 0x10a   :  { %746 = vmatpush3.bf16.msra.mxu0 %v829_v48 }
 0x10b   :  { %747 = vmatprep.subr.bf16.mxu0 %v836_v45 }
 0x10d   :  { %v288_v22 = vld [vmem:[#allocation2 + $0x16] sm:$0x3]  ;;  %v286_v23 = vld [vmem:[#allocation2 + $0x12] sm:$0x3]  ;;  %v287_v28 = vld [vmem:[#allocation2 + $0x14] sm:$0x3] }
 0x10e   :  { %v280_v24 = vld [vmem:[#allocation2 + $0x6] sm:$0x3]  ;;  %v278_v25 = vld [vmem:[#allocation2 + $0x2] sm:$0x3]  ;;  %v279_v31 = vld [vmem:[#allocation2 + $0x4] sm:$0x3]  ;;  %748 = vmatpush3.bf16.msra.mxu0 %v830_v50 }
 0x10f   :  { %v775_v26 = vpack.i.bf16 %v280_v24, %v288_v22  ;;  %v765_v27 = vpack.i.bf16 %v278_v25, %v286_v23  ;;  %v289_v30 = vld [vmem:[#allocation2 + $0x18] sm:$0x3]  ;;  %v770_v35 = vpack.i.bf16 %v279_v31, %v287_v28  ;;  %v291_v36 = vld [vmem:[#allocation2 + $0x1c] sm:$0x3]  ;;  %v290_v40 = vld [vmem:[#allocation2 + $0x1a] sm:$0x3]  ;;  %749 = vmatprep.subr.bf16.mxu0 %v836_v45 }
 0x110   :  { %v281_v29 = vld [vmem:[#allocation2 + $0x8] sm:$0x3]  ;;  %v283_v38 = vld [vmem:[#allocation2 + $0xc] sm:$0x3]  ;;  %v282_v39 = vld [vmem:[#allocation2 + $0xa] sm:$0x3] }
 0x111   :  { %776 = vrot.lane.b32.xlu1 %v775_v26, %s832_s24  ;;  %766 = vrot.lane.b32.xlu0 %v765_v27, %s833_s25  ;;  %v780_v34 = vpack.i.bf16 %v281_v29, %v289_v30  ;;  %v284_v41 = vld [vmem:[#allocation2 + $0xe] sm:$0x3]  ;;  %v790_v43 = vpack.i.bf16 %v283_v38, %v291_v36  ;;  %v785_v44 = vpack.i.bf16 %v282_v39, %v290_v40  ;;  %v292_v47 = vld [vmem:[#allocation2 + $0x1e] sm:$0x3]  ;;  %v285_v57 = vld [vmem:[#allocation2 + $0x10] sm:$0x3] }
 0x112   :  { %v795_v49 = vpack.i.bf16 %v284_v41, %v292_v47  ;;  %v277_v58 = vld [vmem:[#allocation2] sm:$0x3]  ;;  %v831_v26 = vld [vmem:[%s1015_s5 + $0x18] sm:$0xff]  }
 0x113   :  { %750 = vmatpush3.bf16.msra.mxu0 %v831_v26  ;;  %v657_v28 = vld [vmem:[%s1016_s4] ss:$0 sm:$0xff] }
 0x114   :  { %v674_v36 = vld [vmem:[%s1017_s6] ss:$0 sm:$0xff] }
 0x115   :  { %781 = vrot.lane.b32.xlu1 %v780_v34, %s834_s0  ;;  %771 = vrot.lane.b32.xlu0 %v770_v35, %s835_s9 }
 0x119   :  { %791 = vrot.lane.b32.xlu1 %v790_v43, %s837_s14  ;;  %786 = vrot.lane.b32.xlu0 %v785_v44, %s838_s1 }
 0x11d   :  { %796 = vrot.lane.b32.xlu0 %v795_v49, %s839_s3 }
 0x183   :  { %v777_v51 = vpop.permute.xlu1 %776  ;;  %v767_v52 = vpop.permute.xlu0 %766 }
 0x184   :  { %v769_v53 = vunpack.i.h.bf16 %v767_v52  ;;  %v768_v54 = vunpack.i.l.bf16 %v767_v52  ;;  %v779_v61 = vunpack.i.h.bf16 %v777_v51  ;;  %v778_v62 = vunpack.i.l.bf16 %v777_v51 }
 0x186   :  { %v349_v63 = vsel %vm272_vm2, %v277_v58, %v769_v53  ;;  %v362_v0 = vsel %vm272_vm2, %v285_v57, %v768_v54 }
 0x187   :  { %v782_v55 = vpop.permute.xlu1 %781  ;;  %v772_v56 = vpop.permute.xlu0 %771 }
 0x188   :  { %v774_v59 = vunpack.i.h.bf16 %v772_v56  ;;  %v773_v60 = vunpack.i.l.bf16 %v772_v56  ;;  %v784_v3 = vunpack.i.h.bf16 %v782_v55  ;;  %v783_v4 = vunpack.i.l.bf16 %v782_v55 }
 0x18a   :  { %v351_v1 = vsel %vm350_vm3, %v349_v63, %v774_v59  ;;  %v363_v2 = vsel %vm350_vm3, %v362_v0, %v773_v60 }
 0x18b   :  { %v353_v5 = vsel %vm352_vm4, %v351_v1, %v779_v61  ;;  %v364_v6 = vsel %vm352_vm4, %v363_v2, %v778_v62  ;;  %v792_v7 = vpop.permute.xlu1 %791  ;;  %v787_v8 = vpop.permute.xlu0 %786 }
 0x18c   :  { %v789_v9 = vunpack.i.h.bf16 %v787_v8  ;;  %v788_v10 = vunpack.i.l.bf16 %v787_v8  ;;  %v794_v11 = vunpack.i.h.bf16 %v792_v7  ;;  %v793_v12 = vunpack.i.l.bf16 %v792_v7 }
 0x18d   :  { %v355_v13 = vsel %vm354_vm5, %v353_v5, %v784_v3  ;;  %v365_v14 = vsel %vm354_vm5, %v364_v6, %v783_v4 }
 0x18e   :  { %v357_v15 = vsel %vm356_vm6, %v355_v13, %v789_v9  ;;  %v366_v16 = vsel %vm356_vm6, %v365_v14, %v788_v10 }
 0x18f   :  { %v797_v17 = vpop.permute.xlu0 %796  ;;  %v367_v20 = vsel %vm358_vm7, %v366_v16, %v793_v12  ;;  %v359_v21 = vsel %vm358_vm7, %v357_v15, %v794_v11 }
 0x190   :  { %v799_v18 = vunpack.i.h.bf16 %v797_v17  ;;  %v798_v19 = vunpack.i.l.bf16 %v797_v17 }
 0x192   :  { %v368_v22 = vsel %vm360_vm8, %v367_v20, %v798_v19  ;;  %v361_v23 = vsel %vm360_vm8, %v359_v21, %v799_v18 }
 0x193   :  { %v370_v24 = vpack.c.bf16 %v368_v22, %v368_v22  ;;  %v369_v25 = vpack.c.bf16 %v361_v23, %v361_v23 }
 0x195   :  { %538 = vmatprep.mubr.bf16.mxu1 %v370_v24 }
 0x196   :  { %539 = vmatmul.mubr.bf16.vlgmr.msra.gmra.mrb[0].mxu1 %v369_v25 }
 0x269   :  { %v708_v27 = vpop.f32.mrb[0].mxu1 }
 0x26a   :  { %v709_v29 = vpop.f32.mrb[1].mxu1 }
 0x26b   :  { %v710_v30 = vadd.f32 %v709_v29, %v708_v27  ;;  %v711_v31 = vpop.f32.mrb[2].mxu1 }
 0x26c   :  { %v712_v32 = vpop.f32.mrb[3].mxu1 }
 0x26d   :  { %v541_v33 = vadd.f32 %v710_v30, %v657_v28 }
 0x26f   :  { %v546_v34 = vmax.f32 %v541_v33, 0.0 }
 0x271   :  { %v547_v35 = vpack.c.bf16 %v546_v34, %v546_v34 }
 0x273   :  { %752 = vmatmul.mubr.msk.bf16.vlgmr.msra.gmra.mrb[16].mxu0 %vm354_vm5, %v547_v35 }
 0x346   :  { %v624_v37 = vpop.f32.mrb[16].mxu0 }
 0x347   :  { %v625_v38 = vadd.f32 %v674_v36, %v624_v37  ;;  %v753_v39 = vpop.f32.mrb[17].mxu0 }
 0x348   :  { %v627_v40 = vpop.f32.mrb[18].mxu0 }
 0x349   :  { %631 = vst.msk [vmem:[%s1018_s7] sm:$0x3] %vm630_vm10, %v625_v38  ;;  %v754_v41 = vpop.f32.mrb[19].mxu0 }

</bundles_post_ra>
